<compile_context>
chip_gen: v5e
topology: v5e:2x2
jax: 0.10.0
libtpu: 0.0.40
codegen_flags: <defaults>
</compile_context>

<pallas_src>
import functools
import math

import jax
import jax.numpy as jnp
from jax.experimental import pallas as pl
from jax.experimental.pallas import tpu as pltpu


# ------------------------------ tiling helpers ------------------------------

_TM, _TN, _TK = 512, 768, 768        # collapse to full dims when small
_VMEM_LIMIT = 32 * 1024 * 1024       # scoped-VMEM headroom (fits v5e/v6e/v7x)


def _pick_tile(dim, target, multiple):
    """Largest tile <= target that divides dim and is a multiple of `multiple`.
    Falls back to the full dim (always satisfies the (8,128) tiling rule)."""
    if dim <= target:
        return dim
    t = (target // multiple) * multiple
    while t >= multiple:
        if dim % t == 0:
            return t
        t -= multiple
    return dim


def _heads_per_block(num_heads, head_dim):
    """Smallest divisor of num_heads whose packed width is lane-dense (128k)."""
    for hp in range(1, num_heads + 1):
        if num_heads % hp == 0 and (hp * head_dim) % 128 == 0:
            return hp
    # TODO(synk): tiny head dims that can never reach 128 lanes fall back to
    # all heads in one (sub-128-lane) block.
    return num_heads


# ------------------------------ linear kernels ------------------------------

def _linear_kernel(x_ref, w_ref, b_ref, o_ref, acc_ref, *, activation):
    # x:(TM,TK) bf16, w:(TK,TN) bf16 (pre-transposed), b:(1,TN) f32, acc f32.
    @pl.when(pl.program_id(2) == 0)
    def _init():
        acc_ref[...] = jnp.zeros_like(acc_ref)

    acc_ref[...] += jnp.dot(x_ref[...], w_ref[...],
                            preferred_element_type=jnp.float32)

    @pl.when(pl.program_id(2) == pl.num_programs(2) - 1)
    def _finalize():
        y = acc_ref[...] + b_ref[...]
        if activation == "gelu":          # exact (erf) GELU, as in HF BERT
            y = 0.5 * y * (1.0 + jax.lax.erf(y * 0.7071067811865475))
        o_ref[...] = y.astype(o_ref.dtype)


def linear(x, w, b, activation="none", out_dtype=jnp.bfloat16):
    """y = act(x @ w + b).  x:(M,K) bf16, w:(K,N) bf16, b:(N,) f32."""
    M, K = x.shape
    N = w.shape[1]
    tm = _pick_tile(M, _TM, 8)
    tn = _pick_tile(N, _TN, 128)
    tk = _pick_tile(K, _TK, 128)
    grid = (M // tm, N // tn, K // tk)
    return pl.pallas_call(
        functools.partial(_linear_kernel, activation=activation),
        grid=grid,
        in_specs=[
            pl.BlockSpec((tm, tk), lambda i, j, k: (i, k)),
            pl.BlockSpec((tk, tn), lambda i, j, k: (k, j)),
            pl.BlockSpec((1, tn), lambda i, j, k: (0, j)),
        ],
        out_specs=pl.BlockSpec((tm, tn), lambda i, j, k: (i, j)),
        out_shape=jax.ShapeDtypeStruct((M, N), out_dtype),
        scratch_shapes=[pltpu.VMEM((tm, tn), jnp.float32)],
        compiler_params=pltpu.CompilerParams(
            dimension_semantics=("parallel", "parallel", "arbitrary"),
            vmem_limit_bytes=_VMEM_LIMIT),
    )(x, w, b.reshape(1, N))


def _linear_res_ln_kernel(x_ref, w_ref, b_ref, r_ref, g_ref, bt_ref,
                          o_ref, acc_ref, *, eps):
    # LayerNorm(x @ w + b + residual) fused into the matmul epilogue.
    @pl.when(pl.program_id(1) == 0)
    def _init():
        acc_ref[...] = jnp.zeros_like(acc_ref)

    acc_ref[...] += jnp.dot(x_ref[...], w_ref[...],
                            preferred_element_type=jnp.float32)

    @pl.when(pl.program_id(1) == pl.num_programs(1) - 1)
    def _finalize():
        h = acc_ref[...] + b_ref[...] + r_ref[...].astype(jnp.float32)
        mu = jnp.mean(h, axis=-1, keepdims=True)
        var = jnp.mean(jnp.square(h - mu), axis=-1, keepdims=True)
        y = (h - mu) * jax.lax.rsqrt(var + eps) * g_ref[...] + bt_ref[...]
        o_ref[...] = y.astype(o_ref.dtype)


def linear_residual_layernorm(x, w, b, residual, gamma, beta,
                              eps=1e-12, out_dtype=jnp.bfloat16):
    """LayerNorm(x @ w + b + residual); LN over the full output dim (N = H)."""
    M, K = x.shape
    N = w.shape[1]
    tm = _pick_tile(M, _TM, 8)
    tk = _pick_tile(K, _TK, 128)
    grid = (M // tm, K // tk)
    return pl.pallas_call(
        functools.partial(_linear_res_ln_kernel, eps=eps),
        grid=grid,
        in_specs=[
            pl.BlockSpec((tm, tk), lambda i, k: (i, k)),
            pl.BlockSpec((tk, N), lambda i, k: (k, 0)),
            pl.BlockSpec((1, N), lambda i, k: (0, 0)),
            pl.BlockSpec((tm, N), lambda i, k: (i, 0)),
            pl.BlockSpec((1, N), lambda i, k: (0, 0)),
            pl.BlockSpec((1, N), lambda i, k: (0, 0)),
        ],
        out_specs=pl.BlockSpec((tm, N), lambda i, k: (i, 0)),
        out_shape=jax.ShapeDtypeStruct((M, N), out_dtype),
        scratch_shapes=[pltpu.VMEM((tm, N), jnp.float32)],
        compiler_params=pltpu.CompilerParams(
            dimension_semantics=("parallel", "arbitrary"),
            vmem_limit_bytes=_VMEM_LIMIT),
    )(x, w, b.reshape(1, N), residual, gamma.reshape(1, N), beta.reshape(1, N))


def _ln_kernel(x_ref, g_ref, b_ref, o_ref, *, eps):
    # residual-free LayerNorm (embeddings); stats in f32.
    h = x_ref[...].astype(jnp.float32)
    mu = jnp.mean(h, axis=-1, keepdims=True)
    var = jnp.mean(jnp.square(h - mu), axis=-1, keepdims=True)
    o_ref[...] = ((h - mu) * jax.lax.rsqrt(var + eps) * g_ref[...]
                  + b_ref[...]).astype(o_ref.dtype)


def layernorm(x, gamma, beta, eps=1e-12, out_dtype=jnp.bfloat16):
    M, H = x.shape
    tm = _pick_tile(M, _TM, 8)
    return pl.pallas_call(
        functools.partial(_ln_kernel, eps=eps),
        grid=(M // tm,),
        in_specs=[
            pl.BlockSpec((tm, H), lambda i: (i, 0)),
            pl.BlockSpec((1, H), lambda i: (0, 0)),
            pl.BlockSpec((1, H), lambda i: (0, 0)),
        ],
        out_specs=pl.BlockSpec((tm, H), lambda i: (i, 0)),
        out_shape=jax.ShapeDtypeStruct((M, H), out_dtype),
        compiler_params=pltpu.CompilerParams(dimension_semantics=("parallel",)),
    )(x, gamma.reshape(1, H), beta.reshape(1, H))


# ----------------------------- attention kernel -----------------------------

def _attn_kernel(q_ref, k_ref, v_ref, mask_ref, o_ref, *, hp, dh, scale):
    # q/k/v_ref: (S, hp*dh) bf16 column slabs of the fused QKV matrix for one
    # batch row and `hp` packed heads; mask_ref: (1, 1, S) additive f32.
    mask = mask_ref[0]                      # (1, S)
    outs = []
    for h in range(hp):                     # static unroll over packed heads
        qh = q_ref[:, h * dh:(h + 1) * dh]  # (S, Dh)
        kh = k_ref[:, h * dh:(h + 1) * dh]
        vh = v_ref[:, h * dh:(h + 1) * dh]
        s = jax.lax.dot_general(qh, kh, (((1,), (1,)), ((), ())),
                                preferred_element_type=jnp.float32)  # (S, S)
        s = s * scale + mask
        m = jnp.max(s, axis=-1, keepdims=True)
        p = jnp.exp(s - m)
        denom = jnp.sum(p, axis=-1, keepdims=True)
        p = p * pl.reciprocal(denom, approx=True)
        ctx = jnp.dot(p.astype(vh.dtype), vh,
                      preferred_element_type=jnp.float32)            # (S, Dh)
        outs.append(ctx)
    # one lane-dense 128-wide store per block (context already in (B*S,H) layout)
    o_ref[...] = jnp.concatenate(outs, axis=-1).astype(o_ref.dtype)


def attention(qkv, mask, B, S, NH, Dh, scale):
    """qkv: (B*S, 3H) bf16 with column layout [Q | K | V], head-major inside.
    mask: (B, 1, S) additive f32.  Returns context in (B*S, H) layout."""
    # TODO(synk): for long sequences (S >= 1024) tile the KV axis flash-style
    # with running max/sum scratch; full-S blocks are fine at BERT sizes.
    H = NH * Dh
    hp = _heads_per_block(NH, Dh)
    nblk = NH // hp                 # column blocks per Q/K/V section
    P = hp * Dh                     # lane width of one block (128 for Dh=64)
    return pl.pallas_call(
        functools.partial(_attn_kernel, hp=hp, dh=Dh, scale=scale),
        grid=(B, nblk),
        in_specs=[
            pl.BlockSpec((S, P), lambda b, p: (b, p)),               # Q slab
            pl.BlockSpec((S, P), lambda b, p: (b, p + nblk)),        # K slab
            pl.BlockSpec((S, P), lambda b, p: (b, p + 2 * nblk)),    # V slab
            pl.BlockSpec((1, 1, S), lambda b, p: (b, 0, 0)),         # mask row
        ],
        out_specs=pl.BlockSpec((S, P), lambda b, p: (b, p)),
        out_shape=jax.ShapeDtypeStruct((B * S, H), jnp.bfloat16),
        compiler_params=pltpu.CompilerParams(
            dimension_semantics=("parallel", "parallel"),
            vmem_limit_bytes=_VMEM_LIMIT),
    )(qkv, qkv, qkv, mask)


# ------------------------- pooler + regressor head --------------------------

def _pool_reg_kernel(cls_ref, wp_ref, bp_ref, wr_ref, br_ref, o_ref):
    pooled = jnp.tanh(
        jnp.dot(cls_ref[...], wp_ref[...],
                preferred_element_type=jnp.float32) + bp_ref[...])
    # N=1 regressor: VPU multiply + lane reduction (no wasteful MXU pass).
    y = jnp.sum(pooled * wr_ref[...], axis=-1, keepdims=True) + br_ref[...]
    o_ref[...] = y


def pool_and_regress(cls, wp, bp, wr, br):
    B, H = cls.shape
    return pl.pallas_call(
        _pool_reg_kernel,
        out_shape=jax.ShapeDtypeStruct((B, 1), jnp.float32),
        in_specs=[
            pl.BlockSpec((B, H), lambda: (0, 0)),
            pl.BlockSpec((H, H), lambda: (0, 0)),
            pl.BlockSpec((1, H), lambda: (0, 0)),
            pl.BlockSpec((1, H), lambda: (0, 0)),
            pl.BlockSpec((1, 1), lambda: (0, 0)),
        ],
        out_specs=pl.BlockSpec((B, 1), lambda: (0, 0)),
    )(cls, wp, bp.reshape(1, H), wr.reshape(1, H), br.reshape(1, 1))


# ----------------------------- model (wrapper) ------------------------------

def init_params(key, cfg):
    H, I, V, P, L = (cfg["hidden"], cfg["inter"], cfg["vocab"],
                     cfg["max_pos"], cfg["layers"])
    keys = jax.random.split(key, 8 + 8 * L)
    it = iter(keys)

    def w(shape, scale=0.02, dtype=jnp.bfloat16):
        # weights stored pre-transposed as (in_features, out_features) and
        # pre-cast to bf16 so the kernels feed the MXU directly (no in-kernel .T)
        return (scale * jax.random.normal(next(it), shape)).astype(dtype)

    zeros = lambda n: jnp.zeros((n,), jnp.float32)
    ones = lambda n: jnp.ones((n,), jnp.float32)

    params = {
        # embedding tables in bf16: halves embedding-path HBM traffic
        "word_emb": w((V, H)),
        "pos_emb": w((P, H)),
        "type_emb": w((2, H)),
        "emb_ln_g": ones(H), "emb_ln_b": zeros(H),
        "layers": [],
        "pooler_w": w((H, H)), "pooler_b": zeros(H),
        "reg_w": w((1, H), dtype=jnp.float32), "reg_b": zeros(1),
    }
    for _ in range(L):
        params["layers"].append({
            # fused Q/K/V projection: (H, 3H) = [Wq | Wk | Wv], pre-transposed
            "qkv_w": w((H, 3 * H)), "qkv_b": zeros(3 * H),
            "o_w": w((H, H)), "o_b": zeros(H),
            "ln1_g": ones(H), "ln1_b": zeros(H),
            "ffn_w1": w((H, I)), "ffn_b1": zeros(I),
            "ffn_w2": w((I, H)), "ffn_b2": zeros(H),
            "ln2_g": ones(H), "ln2_b": zeros(H),
        })
    return params


def finbert_regressor(params, input_ids, attention_mask, cfg):
    B, S = input_ids.shape
    H, NH = cfg["hidden"], cfg["heads"]
    Dh = H // NH
    scale = 1.0 / math.sqrt(Dh)
    assert S % 8 == 0, "sequence length must be a multiple of 8 (sublane tiling)"

    # --- embeddings (gathers are XLA glue; add in bf16, LN is a Pallas kernel) ---
    positions = jnp.arange(S)
    x = (params["word_emb"][input_ids]
         + params["pos_emb"][positions][None, :, :]
         + params["type_emb"][0][None, None, :])                 # (B,S,H) bf16
    # TODO(synk): token_type hard-coded to segment 0 (module never passes ids).
    x2 = layernorm(x.reshape(B * S, H), params["emb_ln_g"], params["emb_ln_b"])
    # TODO(synk): dropout layers of BertModel are inference no-ops and omitted.

    # --- extended additive attention mask: (B, 1, S) f32 (no per-head copies) ---
    ext = ((1.0 - attention_mask.astype(jnp.float32)) * -1e9).reshape(B, 1, S)

    # --- encoder layers ---
    for lp in params["layers"]:
        # fused Q/K/V projection: one gridded matmul -> (B*S, 3H) bf16
        qkv = linear(x2, lp["qkv_w"], lp["qkv_b"])
        # attention reads Q/K/V column slabs directly and writes (B*S, H):
        # no XLA head split/merge transposes.
        ctx = attention(qkv, ext, B, S, NH, Dh, scale)
        # attention output projection fused with residual add + LayerNorm
        x2 = linear_residual_layernorm(ctx, lp["o_w"], lp["o_b"], x2,
                                       lp["ln1_g"], lp["ln1_b"])
        # FFN: GELU fused into matmul-1 epilogue; residual+LN fused into matmul-2
        h = linear(x2, lp["ffn_w1"], lp["ffn_b1"], activation="gelu")
        x2 = linear_residual_layernorm(h, lp["ffn_w2"], lp["ffn_b2"], x2,
                                       lp["ln2_g"], lp["ln2_b"])

    # --- pooler_output = tanh(dense(CLS)); regressor = Linear(H, 1) ---
    cls = x2.reshape(B, S, H)[:, 0, :]
    y = pool_and_regress(cls, params["pooler_w"], params["pooler_b"],
                         params["reg_w"], params["reg_b"])
    return y[:, 0]  # matches .squeeze(-1) in the PyTorch module -> (B,)


# ---------------------------------- main ------------------------------------

if __name__ == "__main__":
    # small-but-TPU-friendly shapes: Dh = 64 so 2 heads pack a 128-lane block
    cfg = dict(vocab=100, hidden=128, layers=2, heads=2, inter=256, max_pos=16)
    B, S = 2, 8

    params = init_params(jax.random.PRNGKey(0), cfg)

    k_ids, _ = jax.random.split(jax.random.PRNGKey(0))
    input_ids = jax.random.randint(k_ids, (B, S), 0, cfg["vocab"], dtype=jnp.int32)
    attention_mask = jnp.ones((B, S), dtype=jnp.int32).at[:, 6:].set(0)  # padding

    fwd = jax.jit(functools.partial(finbert_regressor, cfg=cfg))
    out = fwd(params, input_ids, attention_mask)
    out = jax.block_until_ready(out)
    assert out.shape == (B,) and out.dtype == jnp.float32
    print("KERNEL_OK")
</pallas_src>

<mosaic_0001>
module attributes {stable_mosaic.version = 11 : i64} {
  func.func @_ln_kernel(%arg0: i32, %arg1: memref<16x128xbf16, #tpu.memory_space<vmem>>, %arg2: memref<1x128xf32, #tpu.memory_space<vmem>>, %arg3: memref<1x128xf32, #tpu.memory_space<vmem>>, %arg4: memref<16x128xbf16, #tpu.memory_space<vmem>>) attributes {dimension_semantics = [#tpu.dimension_semantics<parallel>], iteration_bounds = array<i64: 1>, scalar_prefetch = 0 : i64, scratch_operands = 0 : i64, tpu.core_type = #tpu.core_type<tc>, window_params = [{transform_indices = @transform_0, window_bounds = array<i64: 16, 128>}, {pipeline_mode = #tpu.pipeline_mode<synchronous>, transform_indices = @transform_1, window_bounds = array<i64: 1, 128>}, {pipeline_mode = #tpu.pipeline_mode<synchronous>, transform_indices = @transform_2, window_bounds = array<i64: 1, 128>}, {transform_indices = @transform_3, window_bounds = array<i64: 16, 128>}]} {
    %c0 = arith.constant 0 : index
    %c0_0 = arith.constant 0 : index
    %0 = vector.load %arg1[%c0, %c0_0] : memref<16x128xbf16, #tpu.memory_space<vmem>>, vector<16x128xbf16>
    %1 = arith.extf %0 : vector<16x128xbf16> to vector<16x128xf32>
    %cst = arith.constant dense<0.000000e+00> : vector<16xf32>
    %2 = vector.multi_reduction <add>, %1, %cst [1] : vector<16x128xf32> to vector<16xf32>
    %3 = vector.shape_cast %2 : vector<16xf32> to vector<16x1xf32>
    %cst_1 = arith.constant 1.280000e+02 : f32
    %4 = vector.broadcast %cst_1 : f32 to vector<16x1xf32>
    %5 = arith.divf %3, %4 : vector<16x1xf32>
    %6 = vector.broadcast %5 : vector<16x1xf32> to vector<16x128xf32>
    %7 = arith.subf %1, %6 : vector<16x128xf32>
    %8 = arith.mulf %7, %7 : vector<16x128xf32>
    %cst_2 = arith.constant dense<0.000000e+00> : vector<16xf32>
    %9 = vector.multi_reduction <add>, %8, %cst_2 [1] : vector<16x128xf32> to vector<16xf32>
    %10 = vector.shape_cast %9 : vector<16xf32> to vector<16x1xf32>
    %cst_3 = arith.constant 1.280000e+02 : f32
    %11 = vector.broadcast %cst_3 : f32 to vector<16x1xf32>
    %12 = arith.divf %10, %11 : vector<16x1xf32>
    %13 = vector.broadcast %5 : vector<16x1xf32> to vector<16x128xf32>
    %14 = arith.subf %1, %13 : vector<16x128xf32>
    %cst_4 = arith.constant 9.99999996E-13 : f32
    %15 = vector.broadcast %cst_4 : f32 to vector<16x1xf32>
    %16 = arith.addf %12, %15 : vector<16x1xf32>
    %17 = math.rsqrt %16 : vector<16x1xf32>
    %18 = vector.broadcast %17 : vector<16x1xf32> to vector<16x128xf32>
    %19 = arith.mulf %14, %18 : vector<16x128xf32>
    %c0_5 = arith.constant 0 : index
    %c0_6 = arith.constant 0 : index
    %20 = vector.load %arg2[%c0_5, %c0_6] : memref<1x128xf32, #tpu.memory_space<vmem>>, vector<1x128xf32>
    %21 = vector.broadcast %20 : vector<1x128xf32> to vector<16x128xf32>
    %22 = arith.mulf %19, %21 : vector<16x128xf32>
    %c0_7 = arith.constant 0 : index
    %c0_8 = arith.constant 0 : index
    %23 = vector.load %arg3[%c0_7, %c0_8] : memref<1x128xf32, #tpu.memory_space<vmem>>, vector<1x128xf32>
    %24 = vector.broadcast %23 : vector<1x128xf32> to vector<16x128xf32>
    %25 = arith.addf %22, %24 : vector<16x128xf32>
    %26 = arith.truncf %25 : vector<16x128xf32> to vector<16x128xbf16>
    %c0_9 = arith.constant 0 : index
    %c0_10 = arith.constant 0 : index
    %27 = vector.load %arg4[%c0_9, %c0_10] : memref<16x128xbf16, #tpu.memory_space<vmem>>, vector<16x128xbf16>
    tpu.vector_store %arg4[%c0_9, %c0_10], %26 {strides = array<i32>} : memref<16x128xbf16, #tpu.memory_space<vmem>>, vector<16x128xbf16>,
    return
  }
  func.func @transform_0(%arg0: i32) -> (i32, i32) {
    %c0_i32 = arith.constant 0 : i32
    %c0_i32_0 = arith.constant 0 : i32
    return %arg0, %c0_i32 : i32, i32
  }
  func.func @transform_1(%arg0: i32) -> (i32, i32) {
    %c0_i32 = arith.constant 0 : i32
    %c0_i32_0 = arith.constant 0 : i32
    %c0_i32_1 = arith.constant 0 : i32
    return %c0_i32, %c0_i32_0 : i32, i32
  }
  func.func @transform_2(%arg0: i32) -> (i32, i32) {
    %c0_i32 = arith.constant 0 : i32
    %c0_i32_0 = arith.constant 0 : i32
    %c0_i32_1 = arith.constant 0 : i32
    return %c0_i32, %c0_i32_0 : i32, i32
  }
  func.func @transform_3(%arg0: i32) -> (i32, i32) {
    %c0_i32 = arith.constant 0 : i32
    %c0_i32_0 = arith.constant 0 : i32
    return %arg0, %c0_i32 : i32, i32
  }
}

module attributes {stable_mosaic.version = 11 : i64} {
  func.func @_attn_kernel(%arg0: i32, %arg1: i32, %arg2: memref<8x128xbf16, #tpu.memory_space<vmem>>, %arg3: memref<8x128xbf16, #tpu.memory_space<vmem>>, %arg4: memref<8x128xbf16, #tpu.memory_space<vmem>>, %arg5: memref<1x1x8xf32, #tpu.memory_space<vmem>>, %arg6: memref<8x128xbf16, #tpu.memory_space<vmem>>) attributes {dimension_semantics = [#tpu.dimension_semantics<parallel>, #tpu.dimension_semantics<parallel>], iteration_bounds = array<i64: 2, 1>, scalar_prefetch = 0 : i64, scratch_operands = 0 : i64, tpu.core_type = #tpu.core_type<tc>, window_params = [{transform_indices = @transform_0, window_bounds = array<i64: 8, 128>}, {transform_indices = @transform_1, window_bounds = array<i64: 8, 128>}, {transform_indices = @transform_2, window_bounds = array<i64: 8, 128>}, {transform_indices = @transform_3, window_bounds = array<i64: 1, 1, 8>}, {transform_indices = @transform_4, window_bounds = array<i64: 8, 128>}]} {
    %c0 = arith.constant 0 : index
    %c0_0 = arith.constant 0 : index
    %c0_1 = arith.constant 0 : index
    %0 = vector.load %arg5[%c0, %c0_0, %c0_1] : memref<1x1x8xf32, #tpu.memory_space<vmem>>, vector<1x1x8xf32>
    %1 = vector.shape_cast %0 : vector<1x1x8xf32> to vector<1x8xf32>
    %c0_2 = arith.constant 0 : index
    %c0_3 = arith.constant 0 : index
    %2 = vector.load %arg2[%c0_2, %c0_3] : memref<8x128xbf16, #tpu.memory_space<vmem>>, vector<8x64xbf16>
    %c0_4 = arith.constant 0 : index
    %c0_5 = arith.constant 0 : index
    %3 = vector.load %arg3[%c0_4, %c0_5] : memref<8x128xbf16, #tpu.memory_space<vmem>>, vector<8x64xbf16>
    %c0_6 = arith.constant 0 : index
    %c0_7 = arith.constant 0 : index
    %4 = vector.load %arg4[%c0_6, %c0_7] : memref<8x128xbf16, #tpu.memory_space<vmem>>, vector<8x64xbf16>
    %cst = arith.constant dense<0.000000e+00> : vector<8x8xf32>
    %5 = tpu.matmul %2, %3, %cst {dimension_numbers = #tpu.dot_dimension_numbers<[1], [1], [0], [0], [0, 0, 1, 0], [], []>} : vector<8x64xbf16>, vector<8x64xbf16>, vector<8x8xf32> -> vector<8x8xf32>
    %cst_8 = arith.constant 1.250000e-01 : f32
    %6 = vector.broadcast %cst_8 : f32 to vector<8x8xf32>
    %7 = arith.mulf %5, %6 : vector<8x8xf32>
    %8 = vector.broadcast %1 : vector<1x8xf32> to vector<8x8xf32>
    %9 = arith.addf %7, %8 : vector<8x8xf32>
    %cst_9 = arith.constant dense<0xFF800000> : vector<8xf32>
    %10 = vector.multi_reduction <maximumf>, %9, %cst_9 [1] : vector<8x8xf32> to vector<8xf32>
    %11 = vector.shape_cast %10 : vector<8xf32> to vector<8x1xf32>
    %12 = vector.broadcast %11 : vector<8x1xf32> to vector<8x8xf32>
    %13 = arith.subf %9, %12 : vector<8x8xf32>
    %14 = math.exp %13 : vector<8x8xf32>
    %cst_10 = arith.constant dense<0.000000e+00> : vector<8xf32>
    %15 = vector.multi_reduction <add>, %14, %cst_10 [1] : vector<8x8xf32> to vector<8xf32>
    %16 = vector.shape_cast %15 : vector<8xf32> to vector<8x1xf32>
    %17 = tpu.reciprocal %16 {approx = true} : vector<8x1xf32> -> vector<8x1xf32>
    %18 = vector.broadcast %17 : vector<8x1xf32> to vector<8x8xf32>
    %19 = arith.mulf %14, %18 : vector<8x8xf32>
    %20 = arith.truncf %19 : vector<8x8xf32> to vector<8x8xbf16>
    %cst_11 = arith.constant dense<0.000000e+00> : vector<8x64xf32>
    %21 = tpu.matmul %20, %4, %cst_11 {dimension_numbers = #tpu.dot_dimension_numbers<[1], [0], [0], [1], [0, 0, 1, 1], [], []>} : vector<8x8xbf16>, vector<8x64xbf16>, vector<8x64xf32> -> vector<8x64xf32>
    %c0_12 = arith.constant 0 : index
    %c64 = arith.constant 64 : index
    %22 = vector.load %arg2[%c0_12, %c64] : memref<8x128xbf16, #tpu.memory_space<vmem>>, vector<8x64xbf16>
    %c0_13 = arith.constant 0 : index
    %c64_14 = arith.constant 64 : index
    %23 = vector.load %arg3[%c0_13, %c64_14] : memref<8x128xbf16, #tpu.memory_space<vmem>>, vector<8x64xbf16>
    %c0_15 = arith.constant 0 : index
    %c64_16 = arith.constant 64 : index
    %24 = vector.load %arg4[%c0_15, %c64_16] : memref<8x128xbf16, #tpu.memory_space<vmem>>, vector<8x64xbf16>
    %cst_17 = arith.constant dense<0.000000e+00> : vector<8x8xf32>
    %25 = tpu.matmul %22, %23, %cst_17 {dimension_numbers = #tpu.dot_dimension_numbers<[1], [1], [0], [0], [0, 0, 1, 0], [], []>} : vector<8x64xbf16>, vector<8x64xbf16>, vector<8x8xf32> -> vector<8x8xf32>
    %cst_18 = arith.constant 1.250000e-01 : f32
    %26 = vector.broadcast %cst_18 : f32 to vector<8x8xf32>
    %27 = arith.mulf %25, %26 : vector<8x8xf32>
    %28 = vector.broadcast %1 : vector<1x8xf32> to vector<8x8xf32>
    %29 = arith.addf %27, %28 : vector<8x8xf32>
    %cst_19 = arith.constant dense<0xFF800000> : vector<8xf32>
    %30 = vector.multi_reduction <maximumf>, %29, %cst_19 [1] : vector<8x8xf32> to vector<8xf32>
    %31 = vector.shape_cast %30 : vector<8xf32> to vector<8x1xf32>
    %32 = vector.broadcast %31 : vector<8x1xf32> to vector<8x8xf32>
    %33 = arith.subf %29, %32 : vector<8x8xf32>
    %34 = math.exp %33 : vector<8x8xf32>
    %cst_20 = arith.constant dense<0.000000e+00> : vector<8xf32>
    %35 = vector.multi_reduction <add>, %34, %cst_20 [1] : vector<8x8xf32> to vector<8xf32>
    %36 = vector.shape_cast %35 : vector<8xf32> to vector<8x1xf32>
    %37 = tpu.reciprocal %36 {approx = true} : vector<8x1xf32> -> vector<8x1xf32>
    %38 = vector.broadcast %37 : vector<8x1xf32> to vector<8x8xf32>
    %39 = arith.mulf %34, %38 : vector<8x8xf32>
    %40 = arith.truncf %39 : vector<8x8xf32> to vector<8x8xbf16>
    %cst_21 = arith.constant dense<0.000000e+00> : vector<8x64xf32>
    %41 = tpu.matmul %40, %24, %cst_21 {dimension_numbers = #tpu.dot_dimension_numbers<[1], [0], [0], [1], [0, 0, 1, 1], [], []>} : vector<8x8xbf16>, vector<8x64xbf16>, vector<8x64xf32> -> vector<8x64xf32>
    %42 = tpu.concatenate %21, %41 in 1 : vector<8x64xf32>, vector<8x64xf32> -> vector<8x128xf32>
    %43 = arith.truncf %42 : vector<8x128xf32> to vector<8x128xbf16>
    %c0_22 = arith.constant 0 : index
    %c0_23 = arith.constant 0 : index
    %44 = vector.load %arg6[%c0_22, %c0_23] : memref<8x128xbf16, #tpu.memory_space<vmem>>, vector<8x128xbf16>
    tpu.vector_store %arg6[%c0_22, %c0_23], %43 {strides = array<i32>} : memref<8x128xbf16, #tpu.memory_space<vmem>>, vector<8x128xbf16>,
    return
  }
  func.func @transform_0(%arg0: i32, %arg1: i32) -> (i32, i32) {
    %c0_i32 = arith.constant 0 : i32
    return %arg0, %arg1 : i32, i32
  }
  func.func @transform_1(%arg0: i32, %arg1: i32) -> (i32, i32) {
    %c1_i32 = arith.constant 1 : i32
    %0 = arith.addi %arg1, %c1_i32 : i32
    %c0_i32 = arith.constant 0 : i32
    return %arg0, %0 : i32, i32
  }
  func.func @transform_2(%arg0: i32, %arg1: i32) -> (i32, i32) {
    %c2_i32 = arith.constant 2 : i32
    %0 = arith.addi %arg1, %c2_i32 : i32
    %c0_i32 = arith.constant 0 : i32
    return %arg0, %0 : i32, i32
  }
  func.func @transform_3(%arg0: i32, %arg1: i32) -> (i32, i32, i32) {
    %c0_i32 = arith.constant 0 : i32
    %c0_i32_0 = arith.constant 0 : i32
    %c0_i32_1 = arith.constant 0 : i32
    return %arg0, %c0_i32, %c0_i32_0 : i32, i32, i32
  }
  func.func @transform_4(%arg0: i32, %arg1: i32) -> (i32, i32) {
    %c0_i32 = arith.constant 0 : i32
    return %arg0, %arg1 : i32, i32
  }
}

module attributes {stable_mosaic.version = 11 : i64} {
  func.func @_linear_kernel(%arg0: i32, %arg1: i32, %arg2: i32, %arg3: memref<16x128xbf16, #tpu.memory_space<vmem>>, %arg4: memref<128x384xbf16, #tpu.memory_space<vmem>>, %arg5: memref<1x384xf32, #tpu.memory_space<vmem>>, %arg6: memref<16x384xbf16, #tpu.memory_space<vmem>>, %arg7: memref<16x384xf32, #tpu.memory_space<vmem>>) attributes {dimension_semantics = [#tpu.dimension_semantics<parallel>, #tpu.dimension_semantics<parallel>, #tpu.dimension_semantics<arbitrary>], iteration_bounds = array<i64: 1, 1, 1>, scalar_prefetch = 0 : i64, scratch_operands = 1 : i64, tpu.core_type = #tpu.core_type<tc>, window_params = [{transform_indices = @transform_0, window_bounds = array<i64: 16, 128>}, {transform_indices = @transform_1, window_bounds = array<i64: 128, 384>}, {transform_indices = @transform_2, window_bounds = array<i64: 1, 384>}, {transform_indices = @transform_3, window_bounds = array<i64: 16, 384>}]} {
    %c0_i32 = arith.constant 0 : i32
    %0 = arith.cmpi eq, %arg2, %c0_i32 : i32
    %1 = arith.extui %0 : i1 to i32
    %c0_i32_0 = arith.constant 0 : i32
    %2 = arith.cmpi ne, %1, %c0_i32_0 : i32
    scf.if %2 {
      %cst_10 = arith.constant 0.000000e+00 : f32
      %12 = vector.broadcast %cst_10 : f32 to vector<16x384xf32>
      %c0_11 = arith.constant 0 : index
      %c0_12 = arith.constant 0 : index
      %13 = vector.load %arg7[%c0_11, %c0_12] : memref<16x384xf32, #tpu.memory_space<vmem>>, vector<16x384xf32>
      tpu.vector_store %arg7[%c0_11, %c0_12], %12 {strides = array<i32>} : memref<16x384xf32, #tpu.memory_space<vmem>>, vector<16x384xf32>,
    } else {
    }
    %c0 = arith.constant 0 : index
    %c0_1 = arith.constant 0 : index
    %3 = vector.load %arg7[%c0, %c0_1] : memref<16x384xf32, #tpu.memory_space<vmem>>, vector<16x384xf32>
    %c0_2 = arith.constant 0 : index
    %c0_3 = arith.constant 0 : index
    %4 = vector.load %arg3[%c0_2, %c0_3] : memref<16x128xbf16, #tpu.memory_space<vmem>>, vector<16x128xbf16>
    %c0_4 = arith.constant 0 : index
    %c0_5 = arith.constant 0 : index
    %5 = vector.load %arg4[%c0_4, %c0_5] : memref<128x384xbf16, #tpu.memory_space<vmem>>, vector<128x384xbf16>
    %cst = arith.constant dense<0.000000e+00> : vector<16x384xf32>
    %6 = tpu.matmul %4, %5, %cst {dimension_numbers = #tpu.dot_dimension_numbers<[1], [0], [0], [1], [0, 0, 1, 1], [], []>} : vector<16x128xbf16>, vector<128x384xbf16>, vector<16x384xf32> -> vector<16x384xf32>
    %7 = arith.addf %3, %6 : vector<16x384xf32>
    %c0_6 = arith.constant 0 : index
    %c0_7 = arith.constant 0 : index
    %8 = vector.load %arg7[%c0_6, %c0_7] : memref<16x384xf32, #tpu.memory_space<vmem>>, vector<16x384xf32>
    tpu.vector_store %arg7[%c0_6, %c0_7], %7 {strides = array<i32>} : memref<16x384xf32, #tpu.memory_space<vmem>>, vector<16x384xf32>,
    %c0_i32_8 = arith.constant 0 : i32
    %9 = arith.cmpi eq, %arg2, %c0_i32_8 : i32
    %10 = arith.extui %9 : i1 to i32
    %c0_i32_9 = arith.constant 0 : i32
    %11 = arith.cmpi ne, %10, %c0_i32_9 : i32
    scf.if %11 {
      %c0_10 = arith.constant 0 : index
      %c0_11 = arith.constant 0 : index
      %12 = vector.load %arg7[%c0_10, %c0_11] : memref<16x384xf32, #tpu.memory_space<vmem>>, vector<16x384xf32>
      %c0_12 = arith.constant 0 : index
      %c0_13 = arith.constant 0 : index
      %13 = vector.load %arg5[%c0_12, %c0_13] : memref<1x384xf32, #tpu.memory_space<vmem>>, vector<1x384xf32>
      %14 = vector.broadcast %13 : vector<1x384xf32> to vector<16x384xf32>
      %15 = arith.addf %12, %14 : vector<16x384xf32>
      %16 = arith.truncf %15 : vector<16x384xf32> to vector<16x384xbf16>
      %c0_14 = arith.constant 0 : index
      %c0_15 = arith.constant 0 : index
      %17 = vector.load %arg6[%c0_14, %c0_15] : memref<16x384xbf16, #tpu.memory_space<vmem>>, vector<16x384xbf16>
      tpu.vector_store %arg6[%c0_14, %c0_15], %16 {strides = array<i32>} : memref<16x384xbf16, #tpu.memory_space<vmem>>, vector<16x384xbf16>,
    } else {
    }
    return
  }
  func.func @transform_0(%arg0: i32, %arg1: i32, %arg2: i32) -> (i32, i32) {
    %c0_i32 = arith.constant 0 : i32
    return %arg0, %arg2 : i32, i32
  }
  func.func @transform_1(%arg0: i32, %arg1: i32, %arg2: i32) -> (i32, i32) {
    %c0_i32 = arith.constant 0 : i32
    return %arg2, %arg1 : i32, i32
  }
  func.func @transform_2(%arg0: i32, %arg1: i32, %arg2: i32) -> (i32, i32) {
    %c0_i32 = arith.constant 0 : i32
    %c0_i32_0 = arith.constant 0 : i32
    return %c0_i32, %arg1 : i32, i32
  }
  func.func @transform_3(%arg0: i32, %arg1: i32, %arg2: i32) -> (i32, i32) {
    %c0_i32 = arith.constant 0 : i32
    return %arg0, %arg1 : i32, i32
  }
}

module attributes {stable_mosaic.version = 11 : i64} {
  func.func @_linear_res_ln_kernel(%arg0: i32, %arg1: i32, %arg2: memref<16x128xbf16, #tpu.memory_space<vmem>>, %arg3: memref<128x128xbf16, #tpu.memory_space<vmem>>, %arg4: memref<1x128xf32, #tpu.memory_space<vmem>>, %arg5: memref<16x128xbf16, #tpu.memory_space<vmem>>, %arg6: memref<1x128xf32, #tpu.memory_space<vmem>>, %arg7: memref<1x128xf32, #tpu.memory_space<vmem>>, %arg8: memref<16x128xbf16, #tpu.memory_space<vmem>>, %arg9: memref<16x128xf32, #tpu.memory_space<vmem>>) attributes {dimension_semantics = [#tpu.dimension_semantics<parallel>, #tpu.dimension_semantics<arbitrary>], iteration_bounds = array<i64: 1, 1>, scalar_prefetch = 0 : i64, scratch_operands = 1 : i64, tpu.core_type = #tpu.core_type<tc>, window_params = [{transform_indices = @transform_0, window_bounds = array<i64: 16, 128>}, {transform_indices = @transform_1, window_bounds = array<i64: 128, 128>}, {pipeline_mode = #tpu.pipeline_mode<synchronous>, transform_indices = @transform_2, window_bounds = array<i64: 1, 128>}, {transform_indices = @transform_3, window_bounds = array<i64: 16, 128>}, {pipeline_mode = #tpu.pipeline_mode<synchronous>, transform_indices = @transform_4, window_bounds = array<i64: 1, 128>}, {pipeline_mode = #tpu.pipeline_mode<synchronous>, transform_indices = @transform_5, window_bounds = array<i64: 1, 128>}, {transform_indices = @transform_6, window_bounds = array<i64: 16, 128>}]} {
    %c0_i32 = arith.constant 0 : i32
    %0 = arith.cmpi eq, %arg1, %c0_i32 : i32
    %1 = arith.extui %0 : i1 to i32
    %c0_i32_0 = arith.constant 0 : i32
    %2 = arith.cmpi ne, %1, %c0_i32_0 : i32
    scf.if %2 {
      %cst_10 = arith.constant 0.000000e+00 : f32
      %12 = vector.broadcast %cst_10 : f32 to vector<16x128xf32>
      %c0_11 = arith.constant 0 : index
      %c0_12 = arith.constant 0 : index
      %13 = vector.load %arg9[%c0_11, %c0_12] : memref<16x128xf32, #tpu.memory_space<vmem>>, vector<16x128xf32>
      tpu.vector_store %arg9[%c0_11, %c0_12], %12 {strides = array<i32>} : memref<16x128xf32, #tpu.memory_space<vmem>>, vector<16x128xf32>,
    } else {
    }
    %c0 = arith.constant 0 : index
    %c0_1 = arith.constant 0 : index
    %3 = vector.load %arg9[%c0, %c0_1] : memref<16x128xf32, #tpu.memory_space<vmem>>, vector<16x128xf32>
    %c0_2 = arith.constant 0 : index
    %c0_3 = arith.constant 0 : index
    %4 = vector.load %arg2[%c0_2, %c0_3] : memref<16x128xbf16, #tpu.memory_space<vmem>>, vector<16x128xbf16>
    %c0_4 = arith.constant 0 : index
    %c0_5 = arith.constant 0 : index
    %5 = vector.load %arg3[%c0_4, %c0_5] : memref<128x128xbf16, #tpu.memory_space<vmem>>, vector<128x128xbf16>
    %cst = arith.constant dense<0.000000e+00> : vector<16x128xf32>
    %6 = tpu.matmul %4, %5, %cst {dimension_numbers = #tpu.dot_dimension_numbers<[1], [0], [0], [1], [0, 0, 1, 1], [], []>} : vector<16x128xbf16>, vector<128x128xbf16>, vector<16x128xf32> -> vector<16x128xf32>
    %7 = arith.addf %3, %6 : vector<16x128xf32>
    %c0_6 = arith.constant 0 : index
    %c0_7 = arith.constant 0 : index
    %8 = vector.load %arg9[%c0_6, %c0_7] : memref<16x128xf32, #tpu.memory_space<vmem>>, vector<16x128xf32>
    tpu.vector_store %arg9[%c0_6, %c0_7], %7 {strides = array<i32>} : memref<16x128xf32, #tpu.memory_space<vmem>>, vector<16x128xf32>,
    %c0_i32_8 = arith.constant 0 : i32
    %9 = arith.cmpi eq, %arg1, %c0_i32_8 : i32
    %10 = arith.extui %9 : i1 to i32
    %c0_i32_9 = arith.constant 0 : i32
    %11 = arith.cmpi ne, %10, %c0_i32_9 : i32
    scf.if %11 {
      %c0_10 = arith.constant 0 : index
      %c0_11 = arith.constant 0 : index
      %12 = vector.load %arg9[%c0_10, %c0_11] : memref<16x128xf32, #tpu.memory_space<vmem>>, vector<16x128xf32>
      %c0_12 = arith.constant 0 : index
      %c0_13 = arith.constant 0 : index
      %13 = vector.load %arg4[%c0_12, %c0_13] : memref<1x128xf32, #tpu.memory_space<vmem>>, vector<1x128xf32>
      %14 = vector.broadcast %13 : vector<1x128xf32> to vector<16x128xf32>
      %15 = arith.addf %12, %14 : vector<16x128xf32>
      %c0_14 = arith.constant 0 : index
      %c0_15 = arith.constant 0 : index
      %16 = vector.load %arg5[%c0_14, %c0_15] : memref<16x128xbf16, #tpu.memory_space<vmem>>, vector<16x128xbf16>
      %17 = arith.extf %16 : vector<16x128xbf16> to vector<16x128xf32>
      %18 = arith.addf %15, %17 : vector<16x128xf32>
      %cst_16 = arith.constant dense<0.000000e+00> : vector<16xf32>
      %19 = vector.multi_reduction <add>, %18, %cst_16 [1] : vector<16x128xf32> to vector<16xf32>
      %20 = vector.shape_cast %19 : vector<16xf32> to vector<16x1xf32>
      %cst_17 = arith.constant 1.280000e+02 : f32
      %21 = vector.broadcast %cst_17 : f32 to vector<16x1xf32>
      %22 = arith.divf %20, %21 : vector<16x1xf32>
      %23 = vector.broadcast %22 : vector<16x1xf32> to vector<16x128xf32>
      %24 = arith.subf %18, %23 : vector<16x128xf32>
      %25 = arith.mulf %24, %24 : vector<16x128xf32>
      %cst_18 = arith.constant dense<0.000000e+00> : vector<16xf32>
      %26 = vector.multi_reduction <add>, %25, %cst_18 [1] : vector<16x128xf32> to vector<16xf32>
      %27 = vector.shape_cast %26 : vector<16xf32> to vector<16x1xf32>
      %cst_19 = arith.constant 1.280000e+02 : f32
      %28 = vector.broadcast %cst_19 : f32 to vector<16x1xf32>
      %29 = arith.divf %27, %28 : vector<16x1xf32>
      %30 = vector.broadcast %22 : vector<16x1xf32> to vector<16x128xf32>
      %31 = arith.subf %18, %30 : vector<16x128xf32>
      %cst_20 = arith.constant 9.99999996E-13 : f32
      %32 = vector.broadcast %cst_20 : f32 to vector<16x1xf32>
      %33 = arith.addf %29, %32 : vector<16x1xf32>
      %34 = math.rsqrt %33 : vector<16x1xf32>
      %35 = vector.broadcast %34 : vector<16x1xf32> to vector<16x128xf32>
      %36 = arith.mulf %31, %35 : vector<16x128xf32>
      %c0_21 = arith.constant 0 : index
      %c0_22 = arith.constant 0 : index
      %37 = vector.load %arg6[%c0_21, %c0_22] : memref<1x128xf32, #tpu.memory_space<vmem>>, vector<1x128xf32>
      %38 = vector.broadcast %37 : vector<1x128xf32> to vector<16x128xf32>
      %39 = arith.mulf %36, %38 : vector<16x128xf32>
      %c0_23 = arith.constant 0 : index
      %c0_24 = arith.constant 0 : index
      %40 = vector.load %arg7[%c0_23, %c0_24] : memref<1x128xf32, #tpu.memory_space<vmem>>, vector<1x128xf32>
      %41 = vector.broadcast %40 : vector<1x128xf32> to vector<16x128xf32>
      %42 = arith.addf %39, %41 : vector<16x128xf32>
      %43 = arith.truncf %42 : vector<16x128xf32> to vector<16x128xbf16>
      %c0_25 = arith.constant 0 : index
      %c0_26 = arith.constant 0 : index
      %44 = vector.load %arg8[%c0_25, %c0_26] : memref<16x128xbf16, #tpu.memory_space<vmem>>, vector<16x128xbf16>
      tpu.vector_store %arg8[%c0_25, %c0_26], %43 {strides = array<i32>} : memref<16x128xbf16, #tpu.memory_space<vmem>>, vector<16x128xbf16>,
    } else {
    }
    return
  }
  func.func @transform_0(%arg0: i32, %arg1: i32) -> (i32, i32) {
    %c0_i32 = arith.constant 0 : i32
    return %arg0, %arg1 : i32, i32
  }
  func.func @transform_1(%arg0: i32, %arg1: i32) -> (i32, i32) {
    %c0_i32 = arith.constant 0 : i32
    %c0_i32_0 = arith.constant 0 : i32
    return %arg1, %c0_i32 : i32, i32
  }
  func.func @transform_2(%arg0: i32, %arg1: i32) -> (i32, i32) {
    %c0_i32 = arith.constant 0 : i32
    %c0_i32_0 = arith.constant 0 : i32
    %c0_i32_1 = arith.constant 0 : i32
    return %c0_i32, %c0_i32_0 : i32, i32
  }
  func.func @transform_3(%arg0: i32, %arg1: i32) -> (i32, i32) {
    %c0_i32 = arith.constant 0 : i32
    %c0_i32_0 = arith.constant 0 : i32
    return %arg0, %c0_i32 : i32, i32
  }
  func.func @transform_4(%arg0: i32, %arg1: i32) -> (i32, i32) {
    %c0_i32 = arith.constant 0 : i32
    %c0_i32_0 = arith.constant 0 : i32
    %c0_i32_1 = arith.constant 0 : i32
    return %c0_i32, %c0_i32_0 : i32, i32
  }
  func.func @transform_5(%arg0: i32, %arg1: i32) -> (i32, i32) {
    %c0_i32 = arith.constant 0 : i32
    %c0_i32_0 = arith.constant 0 : i32
    %c0_i32_1 = arith.constant 0 : i32
    return %c0_i32, %c0_i32_0 : i32, i32
  }
  func.func @transform_6(%arg0: i32, %arg1: i32) -> (i32, i32) {
    %c0_i32 = arith.constant 0 : i32
    %c0_i32_0 = arith.constant 0 : i32
    return %arg0, %c0_i32 : i32, i32
  }
}

module attributes {stable_mosaic.version = 11 : i64} {
  func.func @_linear_kernel(%arg0: i32, %arg1: i32, %arg2: i32, %arg3: memref<16x128xbf16, #tpu.memory_space<vmem>>, %arg4: memref<128x256xbf16, #tpu.memory_space<vmem>>, %arg5: memref<1x256xf32, #tpu.memory_space<vmem>>, %arg6: memref<16x256xbf16, #tpu.memory_space<vmem>>, %arg7: memref<16x256xf32, #tpu.memory_space<vmem>>) attributes {dimension_semantics = [#tpu.dimension_semantics<parallel>, #tpu.dimension_semantics<parallel>, #tpu.dimension_semantics<arbitrary>], iteration_bounds = array<i64: 1, 1, 1>, scalar_prefetch = 0 : i64, scratch_operands = 1 : i64, tpu.core_type = #tpu.core_type<tc>, window_params = [{transform_indices = @transform_0, window_bounds = array<i64: 16, 128>}, {transform_indices = @transform_1, window_bounds = array<i64: 128, 256>}, {transform_indices = @transform_2, window_bounds = array<i64: 1, 256>}, {transform_indices = @transform_3, window_bounds = array<i64: 16, 256>}]} {
    %c0_i32 = arith.constant 0 : i32
    %0 = arith.cmpi eq, %arg2, %c0_i32 : i32
    %1 = arith.extui %0 : i1 to i32
    %c0_i32_0 = arith.constant 0 : i32
    %2 = arith.cmpi ne, %1, %c0_i32_0 : i32
    scf.if %2 {
      %cst_10 = arith.constant 0.000000e+00 : f32
      %12 = vector.broadcast %cst_10 : f32 to vector<16x256xf32>
      %c0_11 = arith.constant 0 : index
      %c0_12 = arith.constant 0 : index
      %13 = vector.load %arg7[%c0_11, %c0_12] : memref<16x256xf32, #tpu.memory_space<vmem>>, vector<16x256xf32>
      tpu.vector_store %arg7[%c0_11, %c0_12], %12 {strides = array<i32>} : memref<16x256xf32, #tpu.memory_space<vmem>>, vector<16x256xf32>,
    } else {
    }
    %c0 = arith.constant 0 : index
    %c0_1 = arith.constant 0 : index
    %3 = vector.load %arg7[%c0, %c0_1] : memref<16x256xf32, #tpu.memory_space<vmem>>, vector<16x256xf32>
    %c0_2 = arith.constant 0 : index
    %c0_3 = arith.constant 0 : index
    %4 = vector.load %arg3[%c0_2, %c0_3] : memref<16x128xbf16, #tpu.memory_space<vmem>>, vector<16x128xbf16>
    %c0_4 = arith.constant 0 : index
    %c0_5 = arith.constant 0 : index
    %5 = vector.load %arg4[%c0_4, %c0_5] : memref<128x256xbf16, #tpu.memory_space<vmem>>, vector<128x256xbf16>
    %cst = arith.constant dense<0.000000e+00> : vector<16x256xf32>
    %6 = tpu.matmul %4, %5, %cst {dimension_numbers = #tpu.dot_dimension_numbers<[1], [0], [0], [1], [0, 0, 1, 1], [], []>} : vector<16x128xbf16>, vector<128x256xbf16>, vector<16x256xf32> -> vector<16x256xf32>
    %7 = arith.addf %3, %6 : vector<16x256xf32>
    %c0_6 = arith.constant 0 : index
    %c0_7 = arith.constant 0 : index
    %8 = vector.load %arg7[%c0_6, %c0_7] : memref<16x256xf32, #tpu.memory_space<vmem>>, vector<16x256xf32>
    tpu.vector_store %arg7[%c0_6, %c0_7], %7 {strides = array<i32>} : memref<16x256xf32, #tpu.memory_space<vmem>>, vector<16x256xf32>,
    %c0_i32_8 = arith.constant 0 : i32
    %9 = arith.cmpi eq, %arg2, %c0_i32_8 : i32
    %10 = arith.extui %9 : i1 to i32
    %c0_i32_9 = arith.constant 0 : i32
    %11 = arith.cmpi ne, %10, %c0_i32_9 : i32
    scf.if %11 {
      %c0_10 = arith.constant 0 : index
      %c0_11 = arith.constant 0 : index
      %12 = vector.load %arg7[%c0_10, %c0_11] : memref<16x256xf32, #tpu.memory_space<vmem>>, vector<16x256xf32>
      %c0_12 = arith.constant 0 : index
      %c0_13 = arith.constant 0 : index
      %13 = vector.load %arg5[%c0_12, %c0_13] : memref<1x256xf32, #tpu.memory_space<vmem>>, vector<1x256xf32>
      %14 = vector.broadcast %13 : vector<1x256xf32> to vector<16x256xf32>
      %15 = arith.addf %12, %14 : vector<16x256xf32>
      %cst_14 = arith.constant 5.000000e-01 : f32
      %16 = vector.broadcast %cst_14 : f32 to vector<16x256xf32>
      %17 = arith.mulf %16, %15 : vector<16x256xf32>
      %cst_15 = arith.constant 0.707106769 : f32
      %18 = vector.broadcast %cst_15 : f32 to vector<16x256xf32>
      %19 = arith.mulf %15, %18 : vector<16x256xf32>
      %20 = math.erf %19 : vector<16x256xf32>
      %cst_16 = arith.constant 1.000000e+00 : f32
      %21 = vector.broadcast %cst_16 : f32 to vector<16x256xf32>
      %22 = arith.addf %21, %20 : vector<16x256xf32>
      %23 = arith.mulf %17, %22 : vector<16x256xf32>
      %24 = arith.truncf %23 : vector<16x256xf32> to vector<16x256xbf16>
      %c0_17 = arith.constant 0 : index
      %c0_18 = arith.constant 0 : index
      %25 = vector.load %arg6[%c0_17, %c0_18] : memref<16x256xbf16, #tpu.memory_space<vmem>>, vector<16x256xbf16>
      tpu.vector_store %arg6[%c0_17, %c0_18], %24 {strides = array<i32>} : memref<16x256xbf16, #tpu.memory_space<vmem>>, vector<16x256xbf16>,
    } else {
    }
    return
  }
  func.func @transform_0(%arg0: i32, %arg1: i32, %arg2: i32) -> (i32, i32) {
    %c0_i32 = arith.constant 0 : i32
    return %arg0, %arg2 : i32, i32
  }
  func.func @transform_1(%arg0: i32, %arg1: i32, %arg2: i32) -> (i32, i32) {
    %c0_i32 = arith.constant 0 : i32
    return %arg2, %arg1 : i32, i32
  }
  func.func @transform_2(%arg0: i32, %arg1: i32, %arg2: i32) -> (i32, i32) {
    %c0_i32 = arith.constant 0 : i32
    %c0_i32_0 = arith.constant 0 : i32
    return %c0_i32, %arg1 : i32, i32
  }
  func.func @transform_3(%arg0: i32, %arg1: i32, %arg2: i32) -> (i32, i32) {
    %c0_i32 = arith.constant 0 : i32
    return %arg0, %arg1 : i32, i32
  }
}

module attributes {stable_mosaic.version = 11 : i64} {
  func.func @_linear_res_ln_kernel(%arg0: i32, %arg1: i32, %arg2: memref<16x128xbf16, #tpu.memory_space<vmem>>, %arg3: memref<128x128xbf16, #tpu.memory_space<vmem>>, %arg4: memref<1x128xf32, #tpu.memory_space<vmem>>, %arg5: memref<16x128xbf16, #tpu.memory_space<vmem>>, %arg6: memref<1x128xf32, #tpu.memory_space<vmem>>, %arg7: memref<1x128xf32, #tpu.memory_space<vmem>>, %arg8: memref<16x128xbf16, #tpu.memory_space<vmem>>, %arg9: memref<16x128xf32, #tpu.memory_space<vmem>>) attributes {dimension_semantics = [#tpu.dimension_semantics<parallel>, #tpu.dimension_semantics<arbitrary>], iteration_bounds = array<i64: 1, 1>, scalar_prefetch = 0 : i64, scratch_operands = 1 : i64, tpu.core_type = #tpu.core_type<tc>, window_params = [{transform_indices = @transform_0, window_bounds = array<i64: 16, 128>}, {transform_indices = @transform_1, window_bounds = array<i64: 128, 128>}, {pipeline_mode = #tpu.pipeline_mode<synchronous>, transform_indices = @transform_2, window_bounds = array<i64: 1, 128>}, {transform_indices = @transform_3, window_bounds = array<i64: 16, 128>}, {pipeline_mode = #tpu.pipeline_mode<synchronous>, transform_indices = @transform_4, window_bounds = array<i64: 1, 128>}, {pipeline_mode = #tpu.pipeline_mode<synchronous>, transform_indices = @transform_5, window_bounds = array<i64: 1, 128>}, {transform_indices = @transform_6, window_bounds = array<i64: 16, 128>}]} {
    %c0_i32 = arith.constant 0 : i32
    %0 = arith.cmpi eq, %arg1, %c0_i32 : i32
    %1 = arith.extui %0 : i1 to i32
    %c0_i32_0 = arith.constant 0 : i32
    %2 = arith.cmpi ne, %1, %c0_i32_0 : i32
    scf.if %2 {
      %cst_10 = arith.constant 0.000000e+00 : f32
      %12 = vector.broadcast %cst_10 : f32 to vector<16x128xf32>
      %c0_11 = arith.constant 0 : index
      %c0_12 = arith.constant 0 : index
      %13 = vector.load %arg9[%c0_11, %c0_12] : memref<16x128xf32, #tpu.memory_space<vmem>>, vector<16x128xf32>
      tpu.vector_store %arg9[%c0_11, %c0_12], %12 {strides = array<i32>} : memref<16x128xf32, #tpu.memory_space<vmem>>, vector<16x128xf32>,
    } else {
    }
    %c0 = arith.constant 0 : index
    %c0_1 = arith.constant 0 : index
    %3 = vector.load %arg9[%c0, %c0_1] : memref<16x128xf32, #tpu.memory_space<vmem>>, vector<16x128xf32>
    %c0_2 = arith.constant 0 : index
    %c0_3 = arith.constant 0 : index
    %4 = vector.load %arg2[%c0_2, %c0_3] : memref<16x128xbf16, #tpu.memory_space<vmem>>, vector<16x128xbf16>
    %c0_4 = arith.constant 0 : index
    %c0_5 = arith.constant 0 : index
    %5 = vector.load %arg3[%c0_4, %c0_5] : memref<128x128xbf16, #tpu.memory_space<vmem>>, vector<128x128xbf16>
    %cst = arith.constant dense<0.000000e+00> : vector<16x128xf32>
    %6 = tpu.matmul %4, %5, %cst {dimension_numbers = #tpu.dot_dimension_numbers<[1], [0], [0], [1], [0, 0, 1, 1], [], []>} : vector<16x128xbf16>, vector<128x128xbf16>, vector<16x128xf32> -> vector<16x128xf32>
    %7 = arith.addf %3, %6 : vector<16x128xf32>
    %c0_6 = arith.constant 0 : index
    %c0_7 = arith.constant 0 : index
    %8 = vector.load %arg9[%c0_6, %c0_7] : memref<16x128xf32, #tpu.memory_space<vmem>>, vector<16x128xf32>
    tpu.vector_store %arg9[%c0_6, %c0_7], %7 {strides = array<i32>} : memref<16x128xf32, #tpu.memory_space<vmem>>, vector<16x128xf32>,
    %c0_i32_8 = arith.constant 0 : i32
    %9 = arith.cmpi eq, %arg1, %c0_i32_8 : i32
    %10 = arith.extui %9 : i1 to i32
    %c0_i32_9 = arith.constant 0 : i32
    %11 = arith.cmpi ne, %10, %c0_i32_9 : i32
    scf.if %11 {
      %c0_10 = arith.constant 0 : index
      %c0_11 = arith.constant 0 : index
      %12 = vector.load %arg9[%c0_10, %c0_11] : memref<16x128xf32, #tpu.memory_space<vmem>>, vector<16x128xf32>
      %c0_12 = arith.constant 0 : index
      %c0_13 = arith.constant 0 : index
      %13 = vector.load %arg4[%c0_12, %c0_13] : memref<1x128xf32, #tpu.memory_space<vmem>>, vector<1x128xf32>
      %14 = vector.broadcast %13 : vector<1x128xf32> to vector<16x128xf32>
      %15 = arith.addf %12, %14 : vector<16x128xf32>
      %c0_14 = arith.constant 0 : index
      %c0_15 = arith.constant 0 : index
      %16 = vector.load %arg5[%c0_14, %c0_15] : memref<16x128xbf16, #tpu.memory_space<vmem>>, vector<16x128xbf16>
      %17 = arith.extf %16 : vector<16x128xbf16> to vector<16x128xf32>
      %18 = arith.addf %15, %17 : vector<16x128xf32>
      %cst_16 = arith.constant dense<0.000000e+00> : vector<16xf32>
      %19 = vector.multi_reduction <add>, %18, %cst_16 [1] : vector<16x128xf32> to vector<16xf32>
      %20 = vector.shape_cast %19 : vector<16xf32> to vector<16x1xf32>
      %cst_17 = arith.constant 1.280000e+02 : f32
      %21 = vector.broadcast %cst_17 : f32 to vector<16x1xf32>
      %22 = arith.divf %20, %21 : vector<16x1xf32>
      %23 = vector.broadcast %22 : vector<16x1xf32> to vector<16x128xf32>
      %24 = arith.subf %18, %23 : vector<16x128xf32>
      %25 = arith.mulf %24, %24 : vector<16x128xf32>
      %cst_18 = arith.constant dense<0.000000e+00> : vector<16xf32>
      %26 = vector.multi_reduction <add>, %25, %cst_18 [1] : vector<16x128xf32> to vector<16xf32>
      %27 = vector.shape_cast %26 : vector<16xf32> to vector<16x1xf32>
      %cst_19 = arith.constant 1.280000e+02 : f32
      %28 = vector.broadcast %cst_19 : f32 to vector<16x1xf32>
      %29 = arith.divf %27, %28 : vector<16x1xf32>
      %30 = vector.broadcast %22 : vector<16x1xf32> to vector<16x128xf32>
      %31 = arith.subf %18, %30 : vector<16x128xf32>
      %cst_20 = arith.constant 9.99999996E-13 : f32
      %32 = vector.broadcast %cst_20 : f32 to vector<16x1xf32>
      %33 = arith.addf %29, %32 : vector<16x1xf32>
      %34 = math.rsqrt %33 : vector<16x1xf32>
      %35 = vector.broadcast %34 : vector<16x1xf32> to vector<16x128xf32>
      %36 = arith.mulf %31, %35 : vector<16x128xf32>
      %c0_21 = arith.constant 0 : index
      %c0_22 = arith.constant 0 : index
      %37 = vector.load %arg6[%c0_21, %c0_22] : memref<1x128xf32, #tpu.memory_space<vmem>>, vector<1x128xf32>
      %38 = vector.broadcast %37 : vector<1x128xf32> to vector<16x128xf32>
      %39 = arith.mulf %36, %38 : vector<16x128xf32>
      %c0_23 = arith.constant 0 : index
      %c0_24 = arith.constant 0 : index
      %40 = vector.load %arg7[%c0_23, %c0_24] : memref<1x128xf32, #tpu.memory_space<vmem>>, vector<1x128xf32>
      %41 = vector.broadcast %40 : vector<1x128xf32> to vector<16x128xf32>
      %42 = arith.addf %39, %41 : vector<16x128xf32>
      %43 = arith.truncf %42 : vector<16x128xf32> to vector<16x128xbf16>
      %c0_25 = arith.constant 0 : index
      %c0_26 = arith.constant 0 : index
      %44 = vector.load %arg8[%c0_25, %c0_26] : memref<16x128xbf16, #tpu.memory_space<vmem>>, vector<16x128xbf16>
      tpu.vector_store %arg8[%c0_25, %c0_26], %43 {strides = array<i32>} : memref<16x128xbf16, #tpu.memory_space<vmem>>, vector<16x128xbf16>,
    } else {
    }
    return
  }
  func.func @transform_0(%arg0: i32, %arg1: i32) -> (i32, i32) {
    %c0_i32 = arith.constant 0 : i32
    return %arg0, %arg1 : i32, i32
  }
  func.func @transform_1(%arg0: i32, %arg1: i32) -> (i32, i32) {
    %c0_i32 = arith.constant 0 : i32
    %c0_i32_0 = arith.constant 0 : i32
    return %arg1, %c0_i32 : i32, i32
  }
  func.func @transform_2(%arg0: i32, %arg1: i32) -> (i32, i32) {
    %c0_i32 = arith.constant 0 : i32
    %c0_i32_0 = arith.constant 0 : i32
    %c0_i32_1 = arith.constant 0 : i32
    return %c0_i32, %c0_i32_0 : i32, i32
  }
  func.func @transform_3(%arg0: i32, %arg1: i32) -> (i32, i32) {
    %c0_i32 = arith.constant 0 : i32
    %c0_i32_0 = arith.constant 0 : i32
    return %arg0, %c0_i32 : i32, i32
  }
  func.func @transform_4(%arg0: i32, %arg1: i32) -> (i32, i32) {
    %c0_i32 = arith.constant 0 : i32
    %c0_i32_0 = arith.constant 0 : i32
    %c0_i32_1 = arith.constant 0 : i32
    return %c0_i32, %c0_i32_0 : i32, i32
  }
  func.func @transform_5(%arg0: i32, %arg1: i32) -> (i32, i32) {
    %c0_i32 = arith.constant 0 : i32
    %c0_i32_0 = arith.constant 0 : i32
    %c0_i32_1 = arith.constant 0 : i32
    return %c0_i32, %c0_i32_0 : i32, i32
  }
  func.func @transform_6(%arg0: i32, %arg1: i32) -> (i32, i32) {
    %c0_i32 = arith.constant 0 : i32
    %c0_i32_0 = arith.constant 0 : i32
    return %arg0, %c0_i32 : i32, i32
  }
}

module attributes {stable_mosaic.version = 11 : i64} {
  func.func @_pool_reg_kernel(%arg0: memref<2x128xbf16, #tpu.memory_space<vmem>>, %arg1: memref<128x128xbf16, #tpu.memory_space<vmem>>, %arg2: memref<1x128xf32, #tpu.memory_space<vmem>>, %arg3: memref<1x128xf32, #tpu.memory_space<vmem>>, %arg4: memref<1x1xf32, #tpu.memory_space<vmem>>, %arg5: memref<2x1xf32, #tpu.memory_space<vmem>>) attributes {dimension_semantics = [], scalar_prefetch = 0 : i64, scratch_operands = 0 : i64, tpu.core_type = #tpu.core_type<tc>} {
    %c0 = arith.constant 0 : index
    %c0_0 = arith.constant 0 : index
    %0 = vector.load %arg0[%c0, %c0_0] : memref<2x128xbf16, #tpu.memory_space<vmem>>, vector<2x128xbf16>
    %c0_1 = arith.constant 0 : index
    %c0_2 = arith.constant 0 : index
    %1 = vector.load %arg1[%c0_1, %c0_2] : memref<128x128xbf16, #tpu.memory_space<vmem>>, vector<128x128xbf16>
    %cst = arith.constant dense<0.000000e+00> : vector<2x128xf32>
    %2 = tpu.matmul %0, %1, %cst {dimension_numbers = #tpu.dot_dimension_numbers<[1], [0], [0], [1], [0, 0, 1, 1], [], []>} : vector<2x128xbf16>, vector<128x128xbf16>, vector<2x128xf32> -> vector<2x128xf32>
    %c0_3 = arith.constant 0 : index
    %c0_4 = arith.constant 0 : index
    %3 = vector.load %arg2[%c0_3, %c0_4] : memref<1x128xf32, #tpu.memory_space<vmem>>, vector<1x128xf32>
    %4 = vector.broadcast %3 : vector<1x128xf32> to vector<2x128xf32>
    %5 = arith.addf %2, %4 : vector<2x128xf32>
    %6 = math.tanh %5 : vector<2x128xf32>
    %c0_5 = arith.constant 0 : index
    %c0_6 = arith.constant 0 : index
    %7 = vector.load %arg3[%c0_5, %c0_6] : memref<1x128xf32, #tpu.memory_space<vmem>>, vector<1x128xf32>
    %8 = vector.broadcast %7 : vector<1x128xf32> to vector<2x128xf32>
    %9 = arith.mulf %6, %8 : vector<2x128xf32>
    %cst_7 = arith.constant dense<0.000000e+00> : vector<2xf32>
    %10 = vector.multi_reduction <add>, %9, %cst_7 [1] : vector<2x128xf32> to vector<2xf32>
    %11 = vector.shape_cast %10 : vector<2xf32> to vector<2x1xf32>
    %c0_8 = arith.constant 0 : index
    %c0_9 = arith.constant 0 : index
    %12 = vector.load %arg4[%c0_8, %c0_9] : memref<1x1xf32, #tpu.memory_space<vmem>>, vector<1x1xf32>
    %13 = vector.broadcast %12 : vector<1x1xf32> to vector<2x1xf32>
    %14 = arith.addf %11, %13 : vector<2x1xf32>
    %c0_10 = arith.constant 0 : index
    %c0_11 = arith.constant 0 : index
    %15 = vector.load %arg5[%c0_10, %c0_11] : memref<2x1xf32, #tpu.memory_space<vmem>>, vector<2x1xf32>
    tpu.vector_store %arg5[%c0_10, %c0_11], %14 {strides = array<i32>} : memref<2x1xf32, #tpu.memory_space<vmem>>, vector<2x1xf32>,
    return
  }
}

module attributes {stable_mosaic.version = 11 : i64} {
  func.func @_linear_res_ln_kernel(%arg0: i32, %arg1: i32, %arg2: memref<16x256xbf16, #tpu.memory_space<vmem>>, %arg3: memref<256x128xbf16, #tpu.memory_space<vmem>>, %arg4: memref<1x128xf32, #tpu.memory_space<vmem>>, %arg5: memref<16x128xbf16, #tpu.memory_space<vmem>>, %arg6: memref<1x128xf32, #tpu.memory_space<vmem>>, %arg7: memref<1x128xf32, #tpu.memory_space<vmem>>, %arg8: memref<16x128xbf16, #tpu.memory_space<vmem>>, %arg9: memref<16x128xf32, #tpu.memory_space<vmem>>) attributes {dimension_semantics = [#tpu.dimension_semantics<parallel>, #tpu.dimension_semantics<arbitrary>], iteration_bounds = array<i64: 1, 1>, scalar_prefetch = 0 : i64, scratch_operands = 1 : i64, tpu.core_type = #tpu.core_type<tc>, window_params = [{transform_indices = @transform_0, window_bounds = array<i64: 16, 256>}, {transform_indices = @transform_1, window_bounds = array<i64: 256, 128>}, {pipeline_mode = #tpu.pipeline_mode<synchronous>, transform_indices = @transform_2, window_bounds = array<i64: 1, 128>}, {transform_indices = @transform_3, window_bounds = array<i64: 16, 128>}, {pipeline_mode = #tpu.pipeline_mode<synchronous>, transform_indices = @transform_4, window_bounds = array<i64: 1, 128>}, {pipeline_mode = #tpu.pipeline_mode<synchronous>, transform_indices = @transform_5, window_bounds = array<i64: 1, 128>}, {transform_indices = @transform_6, window_bounds = array<i64: 16, 128>}]} {
    %c0_i32 = arith.constant 0 : i32
    %0 = arith.cmpi eq, %arg1, %c0_i32 : i32
    %1 = arith.extui %0 : i1 to i32
    %c0_i32_0 = arith.constant 0 : i32
    %2 = arith.cmpi ne, %1, %c0_i32_0 : i32
    scf.if %2 {
      %cst_10 = arith.constant 0.000000e+00 : f32
      %12 = vector.broadcast %cst_10 : f32 to vector<16x128xf32>
      %c0_11 = arith.constant 0 : index
      %c0_12 = arith.constant 0 : index
      %13 = vector.load %arg9[%c0_11, %c0_12] : memref<16x128xf32, #tpu.memory_space<vmem>>, vector<16x128xf32>
      tpu.vector_store %arg9[%c0_11, %c0_12], %12 {strides = array<i32>} : memref<16x128xf32, #tpu.memory_space<vmem>>, vector<16x128xf32>,
    } else {
    }
    %c0 = arith.constant 0 : index
    %c0_1 = arith.constant 0 : index
    %3 = vector.load %arg9[%c0, %c0_1] : memref<16x128xf32, #tpu.memory_space<vmem>>, vector<16x128xf32>
    %c0_2 = arith.constant 0 : index
    %c0_3 = arith.constant 0 : index
    %4 = vector.load %arg2[%c0_2, %c0_3] : memref<16x256xbf16, #tpu.memory_space<vmem>>, vector<16x256xbf16>
    %c0_4 = arith.constant 0 : index
    %c0_5 = arith.constant 0 : index
    %5 = vector.load %arg3[%c0_4, %c0_5] : memref<256x128xbf16, #tpu.memory_space<vmem>>, vector<256x128xbf16>
    %cst = arith.constant dense<0.000000e+00> : vector<16x128xf32>
    %6 = tpu.matmul %4, %5, %cst {dimension_numbers = #tpu.dot_dimension_numbers<[1], [0], [0], [1], [0, 0, 1, 1], [], []>} : vector<16x256xbf16>, vector<256x128xbf16>, vector<16x128xf32> -> vector<16x128xf32>
    %7 = arith.addf %3, %6 : vector<16x128xf32>
    %c0_6 = arith.constant 0 : index
    %c0_7 = arith.constant 0 : index
    %8 = vector.load %arg9[%c0_6, %c0_7] : memref<16x128xf32, #tpu.memory_space<vmem>>, vector<16x128xf32>
    tpu.vector_store %arg9[%c0_6, %c0_7], %7 {strides = array<i32>} : memref<16x128xf32, #tpu.memory_space<vmem>>, vector<16x128xf32>,
    %c0_i32_8 = arith.constant 0 : i32
    %9 = arith.cmpi eq, %arg1, %c0_i32_8 : i32
    %10 = arith.extui %9 : i1 to i32
    %c0_i32_9 = arith.constant 0 : i32
    %11 = arith.cmpi ne, %10, %c0_i32_9 : i32
    scf.if %11 {
      %c0_10 = arith.constant 0 : index
      %c0_11 = arith.constant 0 : index
      %12 = vector.load %arg9[%c0_10, %c0_11] : memref<16x128xf32, #tpu.memory_space<vmem>>, vector<16x128xf32>
      %c0_12 = arith.constant 0 : index
      %c0_13 = arith.constant 0 : index
      %13 = vector.load %arg4[%c0_12, %c0_13] : memref<1x128xf32, #tpu.memory_space<vmem>>, vector<1x128xf32>
      %14 = vector.broadcast %13 : vector<1x128xf32> to vector<16x128xf32>
      %15 = arith.addf %12, %14 : vector<16x128xf32>
      %c0_14 = arith.constant 0 : index
      %c0_15 = arith.constant 0 : index
      %16 = vector.load %arg5[%c0_14, %c0_15] : memref<16x128xbf16, #tpu.memory_space<vmem>>, vector<16x128xbf16>
      %17 = arith.extf %16 : vector<16x128xbf16> to vector<16x128xf32>
      %18 = arith.addf %15, %17 : vector<16x128xf32>
      %cst_16 = arith.constant dense<0.000000e+00> : vector<16xf32>
      %19 = vector.multi_reduction <add>, %18, %cst_16 [1] : vector<16x128xf32> to vector<16xf32>
      %20 = vector.shape_cast %19 : vector<16xf32> to vector<16x1xf32>
      %cst_17 = arith.constant 1.280000e+02 : f32
      %21 = vector.broadcast %cst_17 : f32 to vector<16x1xf32>
      %22 = arith.divf %20, %21 : vector<16x1xf32>
      %23 = vector.broadcast %22 : vector<16x1xf32> to vector<16x128xf32>
      %24 = arith.subf %18, %23 : vector<16x128xf32>
      %25 = arith.mulf %24, %24 : vector<16x128xf32>
      %cst_18 = arith.constant dense<0.000000e+00> : vector<16xf32>
      %26 = vector.multi_reduction <add>, %25, %cst_18 [1] : vector<16x128xf32> to vector<16xf32>
      %27 = vector.shape_cast %26 : vector<16xf32> to vector<16x1xf32>
      %cst_19 = arith.constant 1.280000e+02 : f32
      %28 = vector.broadcast %cst_19 : f32 to vector<16x1xf32>
      %29 = arith.divf %27, %28 : vector<16x1xf32>
      %30 = vector.broadcast %22 : vector<16x1xf32> to vector<16x128xf32>
      %31 = arith.subf %18, %30 : vector<16x128xf32>
      %cst_20 = arith.constant 9.99999996E-13 : f32
      %32 = vector.broadcast %cst_20 : f32 to vector<16x1xf32>
      %33 = arith.addf %29, %32 : vector<16x1xf32>
      %34 = math.rsqrt %33 : vector<16x1xf32>
      %35 = vector.broadcast %34 : vector<16x1xf32> to vector<16x128xf32>
      %36 = arith.mulf %31, %35 : vector<16x128xf32>
      %c0_21 = arith.constant 0 : index
      %c0_22 = arith.constant 0 : index
      %37 = vector.load %arg6[%c0_21, %c0_22] : memref<1x128xf32, #tpu.memory_space<vmem>>, vector<1x128xf32>
      %38 = vector.broadcast %37 : vector<1x128xf32> to vector<16x128xf32>
      %39 = arith.mulf %36, %38 : vector<16x128xf32>
      %c0_23 = arith.constant 0 : index
      %c0_24 = arith.constant 0 : index
      %40 = vector.load %arg7[%c0_23, %c0_24] : memref<1x128xf32, #tpu.memory_space<vmem>>, vector<1x128xf32>
      %41 = vector.broadcast %40 : vector<1x128xf32> to vector<16x128xf32>
      %42 = arith.addf %39, %41 : vector<16x128xf32>
      %43 = arith.truncf %42 : vector<16x128xf32> to vector<16x128xbf16>
      %c0_25 = arith.constant 0 : index
      %c0_26 = arith.constant 0 : index
      %44 = vector.load %arg8[%c0_25, %c0_26] : memref<16x128xbf16, #tpu.memory_space<vmem>>, vector<16x128xbf16>
      tpu.vector_store %arg8[%c0_25, %c0_26], %43 {strides = array<i32>} : memref<16x128xbf16, #tpu.memory_space<vmem>>, vector<16x128xbf16>,
    } else {
    }
    return
  }
  func.func @transform_0(%arg0: i32, %arg1: i32) -> (i32, i32) {
    %c0_i32 = arith.constant 0 : i32
    return %arg0, %arg1 : i32, i32
  }
  func.func @transform_1(%arg0: i32, %arg1: i32) -> (i32, i32) {
    %c0_i32 = arith.constant 0 : i32
    %c0_i32_0 = arith.constant 0 : i32
    return %arg1, %c0_i32 : i32, i32
  }
  func.func @transform_2(%arg0: i32, %arg1: i32) -> (i32, i32) {
    %c0_i32 = arith.constant 0 : i32
    %c0_i32_0 = arith.constant 0 : i32
    %c0_i32_1 = arith.constant 0 : i32
    return %c0_i32, %c0_i32_0 : i32, i32
  }
  func.func @transform_3(%arg0: i32, %arg1: i32) -> (i32, i32) {
    %c0_i32 = arith.constant 0 : i32
    %c0_i32_0 = arith.constant 0 : i32
    return %arg0, %c0_i32 : i32, i32
  }
  func.func @transform_4(%arg0: i32, %arg1: i32) -> (i32, i32) {
    %c0_i32 = arith.constant 0 : i32
    %c0_i32_0 = arith.constant 0 : i32
    %c0_i32_1 = arith.constant 0 : i32
    return %c0_i32, %c0_i32_0 : i32, i32
  }
  func.func @transform_5(%arg0: i32, %arg1: i32) -> (i32, i32) {
    %c0_i32 = arith.constant 0 : i32
    %c0_i32_0 = arith.constant 0 : i32
    %c0_i32_1 = arith.constant 0 : i32
    return %c0_i32, %c0_i32_0 : i32, i32
  }
  func.func @transform_6(%arg0: i32, %arg1: i32) -> (i32, i32) {
    %c0_i32 = arith.constant 0 : i32
    %c0_i32_0 = arith.constant 0 : i32
    return %arg0, %c0_i32 : i32, i32
  }
}

</mosaic_0001>

<bundles_post_ra>
// kernel: finbert_regressor.12
= control target key start
LH: loop header
LB: loop body
LE: loop exit
PB: predicated region body
PF: predicated region fallthrough
CT: control target
= control target key end

     0   :  { %v103_v3 = vmov 128.0   ;;  %s136_s0 = inlined_call_operand.vmem [shape: bf16[16,128], index: 0, kind: input, shape index: {}]   ;;  %s137_s1 = inlined_call_operand.vmem [shape: f32[1,128], index: 1, kind: input, shape index: {}]   ;;  %s138_s2 = inlined_call_operand.vmem [shape: f32[1,128], index: 2, kind: input, shape index: {}]   ;;  %s139_s3 = inlined_call_operand.vmem [shape: bf16[16,128], index: 3, kind: output, shape index: {}]  }
   0x1   :  { %v86_v0 = vld [vmem:[%s136_s0] sm:$0xff]   ;;  %97 = vrcp.f32 %v103_v3 }
   0x2   :  { %v87_v1 = vunpack.c.l.bf16 %v86_v0  ;;  %v88_v2 = vunpack.c.h.bf16 %v86_v0  ;;  %v95_v36 = vld [vmem:[%s137_s1] ss:$0 sm:$0xff] }
   0x3   :  { %v96_v40 = vld [vmem:[%s138_s2] ss:$0 sm:$0xff] }
   0x4   :  { %18 = vadd.xlane.f32.xlu0 %v87_v1 }
   0x7   :  { %v98_v4 = vpop.eup %97 }
   0x8   :  { %v23_v5 = vmul.f32 128.0, %v98_v4  ;;  %vm27_vm0 = vweird.f32 %v98_v4 }
   0xa   :  { %v24_v6 = vsub.f32 1.0, %v23_v5 }
   0xc   :  { %20 = vadd.xlane.f32.xlu0 %v88_v2  ;;  %v25_v7 = vmul.f32 %v98_v4, %v24_v6 }
   0xe   :  { %v26_v8 = vadd.f32 %v98_v4, %v25_v7 }
  0x10   :  { %v28_v9 = vsel %vm27_vm0, %v98_v4, %v26_v8 }
  0x77   :  { %v19_v10 = vpop.xlane.xlu0 %18 }
  0x78   :  { %v29_v11 = vmul.f32 %v28_v9, %v19_v10 }
  0x7a   :  { %v31_v12 = vsub.f32 %v87_v1, %v29_v11 }
  0x7c   :  { %v33_v13 = vmul.f32 %v31_v12, %v31_v12 }
  0x7e   :  { %35 = vadd.xlane.f32.xlu1 %v33_v13 }
  0x7f   :  { %v21_v14 = vpop.xlane.xlu0 %20 }
  0x80   :  { %v30_v15 = vmul.f32 %v28_v9, %v21_v14 }
  0x82   :  { %v32_v16 = vsub.f32 %v88_v2, %v30_v15 }
  0x84   :  { %v34_v17 = vmul.f32 %v32_v16, %v32_v16 }
  0x86   :  { %37 = vadd.xlane.f32.xlu1 %v34_v17 }
  0xf1   :  { %v36_v18 = vpop.xlane.xlu1 %35 }
  0xf2   :  { %v39_v19 = vmul.f32 %v36_v18, %v28_v9 }
  0xf4   :  { %v41_v20 = vadd.f32 1e-12, %v39_v19 }
  0xf6   :  { %99 = vrsqrt.f32 %v41_v20  ;;  %vm49_vm2 = vweird.f32 %v41_v20 }
  0xf9   :  { %v38_v21 = vpop.xlane.xlu1 %37 }
  0xfa   :  { %v40_v22 = vmul.f32 %v38_v21, %v28_v9 }
  0xfc   :  { %v100_v23 = vpop.eup %99  ;;  %v42_v24 = vadd.f32 1e-12, %v40_v22 }
  0xfd   :  { %v44_v25 = vmul.f32 %v100_v23, %v41_v20  ;;  %vm50_vm1 = vweird.f32 %v100_v23 }
  0xfe   :  { %101 = vrsqrt.f32 %v42_v24  ;;  %vm51_vm3 = vmor %vm49_vm2, %vm50_vm1  ;;  %vm59_vm5 = vweird.f32 %v42_v24 }
  0xff   :  { %v45_v26 = vmul.f32 %v100_v23, %v44_v25 }
 0x101   :  { %v46_v27 = vmul.f32 0.5, %v45_v26 }
 0x103   :  { %v47_v28 = vsub.f32 1.5, %v46_v27 }
 0x104   :  { %v102_v29 = vpop.eup %101 }
 0x105   :  { %v48_v30 = vmul.f32 %v100_v23, %v47_v28  ;;  %v54_v31 = vmul.f32 %v102_v29, %v42_v24  ;;  %vm60_vm4 = vweird.f32 %v102_v29 }
 0x106   :  { %vm61_vm6 = vmor %vm59_vm5, %vm60_vm4 }
 0x107   :  { %v55_v32 = vmul.f32 %v102_v29, %v54_v31  ;;  %v52_v33 = vsel %vm51_vm3, %v100_v23, %v48_v30 }
 0x108   :  { %v63_v37 = vmul.f32 %v52_v33, %v31_v12 }
 0x109   :  { %v56_v34 = vmul.f32 0.5, %v55_v32 }
 0x10a   :  { %v69_v41 = vmul.f32 %v95_v36, %v63_v37 }
 0x10b   :  { %v57_v35 = vsub.f32 1.5, %v56_v34 }
 0x10c   :  { %v75_v44 = vadd.f32 %v96_v40, %v69_v41 }
 0x10d   :  { %v58_v38 = vmul.f32 %v102_v29, %v57_v35 }
 0x10f   :  { %v62_v39 = vsel %vm61_vm6, %v102_v29, %v58_v38 }
 0x110   :  { %v64_v42 = vmul.f32 %v62_v39, %v32_v16 }
 0x112   :  { %v70_v43 = vmul.f32 %v95_v36, %v64_v42 }
 0x114   :  { %v76_v45 = vadd.f32 %v96_v40, %v70_v43 }
 0x116   :  { %v92_v46 = vpack.c.bf16 %v76_v45, %v75_v44 }
 0x118   :  { %93 = vst [vmem:[%s139_s3] sm:$0xff] %v92_v46  }

// kernel: finbert_regressor.13
= control target key start
LH: loop header
LB: loop body
LE: loop exit
PB: predicated region body
PF: predicated region fallthrough
CT: control target
= control target key end

     0   :  { %8 = vsyncpa [#allocation4], 0  ;;  %s458_s15 = smov [#allocation3]   ;;  %s459_s17 = smov 192   ;;  %s502_s0 = inlined_call_operand.vmem [shape: bf16[16,128], index: 0, kind: input, shape index: {}]   ;;  %s503_s1 = inlined_call_operand.hbm [shape: bf16[128,384], index: 1, kind: input, shape index: {}]   ;;  %s504_s2 = inlined_call_operand.vmem [shape: f32[1,384], index: 2, kind: input, shape index: {}]   ;;  %s505_s3 = inlined_call_operand.vmem [shape: bf16[16,384], index: 3, kind: output, shape index: {}]  }
   0x1   :  { %s15_s14 = sshll.u32 %s503_s1, 4  ;;  %s17_s16 = sshll.u32 %s458_s15, 4  ;;  %s16_s14 = int_to_ptr.hbm [resolvable:$true] %s15_s14  ;;  %s18_s16 = int_to_ptr.vmem [resolvable:$true] %s17_s16 }
   0x2   :  { %s460_s18 = smov 12  }
   0x3   :  { %23 = dma.hbm_to_vmem [thread:$0]  %s16_s14, 3072, %s18_s16, [#allocation4], %s459_s17, %s459_s17, %s460_s18  }
   0x4   :  { %456 = dma.done.wait [#allocation4], 3072  }
   0x5   :  { %457 = vsyncadd [#allocation4], 4294964224  ;;  %v394_v0 = vld [vmem:[#allocation3 + $0xa8] sm:$0xf]  ;;  %v427_v1 = vld [vmem:[#allocation3 + $0xb0] sm:$0xf0] }
   0x6   :  { %v426_v2 = vld [vmem:[#allocation3 + $0xac] sm:$0xf]  ;;  %v395_v3 = vor.u32 %v427_v1, %v394_v0  ;;  %v396_v4 = vld [vmem:[#allocation3 + $0xb4] sm:$0xf0]  ;;  %v402_v5 = vld [vmem:[#allocation3 + $0xb0] sm:$0xf] }
   0x7   :  { %v428_v6 = vld [vmem:[#allocation3 + $0xb8] sm:$0xf0]  ;;  %v399_v7 = vor.u32 %v426_v2, %v396_v4  ;;  %v382_v9 = vld [vmem:[#allocation3 + $0x90] sm:$0xf]  ;;  %v423_v11 = vld [vmem:[#allocation3 + $0x94] sm:$0xf] }
   0x8   :  { %v403_v8 = vor.u32 %v428_v6, %v402_v5  ;;  %v424_v10 = vld [vmem:[#allocation3 + $0x98] sm:$0xf0]  ;;  %214 = vmatpush.bf16.msra.mxu0 %v395_v3  ;;  %v384_v13 = vld [vmem:[#allocation3 + $0x9c] sm:$0xf0]  ;;  %v390_v14 = vld [vmem:[#allocation3 + $0x98] sm:$0xf] }
   0x9   :  { %v383_v12 = vor.u32 %v424_v10, %v382_v9  ;;  %v425_v15 = vld [vmem:[#allocation3 + $0xa0] sm:$0xf0]  ;;  %228 = vmatpush.bf16.msra.mxu1 %v399_v7  ;;  %v387_v16 = vor.u32 %v423_v11, %v384_v13  ;;  %v370_v18 = vld [vmem:[#allocation3 + $0x78] sm:$0xf]  ;;  %v420_v20 = vld [vmem:[#allocation3 + $0x7c] sm:$0xf] }
   0xa   :  { %242 = vmatpush.bf16.msra.mxu2 %v403_v8  ;;  %v391_v17 = vor.u32 %v425_v15, %v390_v14  ;;  %v421_v19 = vld [vmem:[#allocation3 + $0x80] sm:$0xf0]  ;;  %v372_v21 = vld [vmem:[#allocation3 + $0x84] sm:$0xf0]  ;;  %v378_v22 = vld [vmem:[#allocation3 + $0x80] sm:$0xf] }
   0xb   :  { %v422_v23 = vld [vmem:[#allocation3 + $0x88] sm:$0xf0]  ;;  %v371_v24 = vor.u32 %v421_v19, %v370_v18  ;;  %v375_v25 = vor.u32 %v420_v20, %v372_v21  ;;  %v358_v27 = vld [vmem:[#allocation3 + $0x60] sm:$0xf]  ;;  %v417_v29 = vld [vmem:[#allocation3 + $0x64] sm:$0xf] }
   0xc   :  { %215 = vmatpush.bf16.msra.mxu0 %v383_v12  ;;  %v379_v26 = vor.u32 %v422_v23, %v378_v22  ;;  %v418_v28 = vld [vmem:[#allocation3 + $0x68] sm:$0xf0]  ;;  %v360_v30 = vld [vmem:[#allocation3 + $0x6c] sm:$0xf0]  ;;  %v366_v31 = vld [vmem:[#allocation3 + $0x68] sm:$0xf] }
   0xd   :  { %229 = vmatpush.bf16.msra.mxu1 %v387_v16  ;;  %v419_v32 = vld [vmem:[#allocation3 + $0x70] sm:$0xf0]  ;;  %v359_v33 = vor.u32 %v418_v28, %v358_v27  ;;  %v363_v34 = vor.u32 %v417_v29, %v360_v30  ;;  %v346_v36 = vld [vmem:[#allocation3 + $0x48] sm:$0xf]  ;;  %v414_v38 = vld [vmem:[#allocation3 + $0x4c] sm:$0xf] }
   0xe   :  { %243 = vmatpush.bf16.msra.mxu2 %v391_v17  ;;  %v367_v35 = vor.u32 %v419_v32, %v366_v31  ;;  %v415_v37 = vld [vmem:[#allocation3 + $0x50] sm:$0xf0]  ;;  %v348_v39 = vld [vmem:[#allocation3 + $0x54] sm:$0xf0]  ;;  %v354_v40 = vld [vmem:[#allocation3 + $0x50] sm:$0xf] }
   0xf   :  { %v416_v41 = vld [vmem:[#allocation3 + $0x58] sm:$0xf0]  ;;  %v347_v42 = vor.u32 %v415_v37, %v346_v36  ;;  %v351_v43 = vor.u32 %v414_v38, %v348_v39  ;;  %v334_v45 = vld [vmem:[#allocation3 + $0x30] sm:$0xf]  ;;  %v411_v47 = vld [vmem:[#allocation3 + $0x34] sm:$0xf] }
  0x10   :  { %216 = vmatpush.bf16.msra.mxu0 %v371_v24  ;;  %v355_v44 = vor.u32 %v416_v41, %v354_v40  ;;  %v412_v46 = vld [vmem:[#allocation3 + $0x38] sm:$0xf0]  ;;  %v336_v48 = vld [vmem:[#allocation3 + $0x3c] sm:$0xf0]  ;;  %v342_v49 = vld [vmem:[#allocation3 + $0x38] sm:$0xf] }
  0x11   :  { %230 = vmatpush.bf16.msra.mxu1 %v375_v25  ;;  %v413_v50 = vld [vmem:[#allocation3 + $0x40] sm:$0xf0]  ;;  %v335_v51 = vor.u32 %v412_v46, %v334_v45  ;;  %v339_v52 = vor.u32 %v411_v47, %v336_v48  ;;  %v322_v54 = vld [vmem:[#allocation3 + $0x18] sm:$0xf]  ;;  %v408_v56 = vld [vmem:[#allocation3 + $0x1c] sm:$0xf] }
  0x12   :  { %244 = vmatpush.bf16.msra.mxu2 %v379_v26  ;;  %v343_v53 = vor.u32 %v413_v50, %v342_v49  ;;  %v409_v55 = vld [vmem:[#allocation3 + $0x20] sm:$0xf0]  ;;  %v324_v57 = vld [vmem:[#allocation3 + $0x24] sm:$0xf0]  ;;  %v330_v58 = vld [vmem:[#allocation3 + $0x20] sm:$0xf] }
  0x13   :  { %v410_v59 = vld [vmem:[#allocation3 + $0x28] sm:$0xf0]  ;;  %v323_v60 = vor.u32 %v409_v55, %v322_v54  ;;  %v327_v61 = vor.u32 %v408_v56, %v324_v57  ;;  %v310_v63 = vld [vmem:[#allocation3] sm:$0xf]  ;;  %v405_v1 = vld [vmem:[#allocation3 + $0x4] sm:$0xf] }
  0x14   :  { %217 = vmatpush.bf16.msra.mxu0 %v359_v33  ;;  %v331_v62 = vor.u32 %v410_v59, %v330_v58  ;;  %v406_v0 = vld [vmem:[#allocation3 + $0x8] sm:$0xf0]  ;;  %v312_v2 = vld [vmem:[#allocation3 + $0xc] sm:$0xf0]  ;;  %v318_v3 = vld [vmem:[#allocation3 + $0x8] sm:$0xf] }
  0x15   :  { %231 = vmatpush.bf16.msra.mxu1 %v363_v34  ;;  %v407_v4 = vld [vmem:[#allocation3 + $0x10] sm:$0xf0]  ;;  %v311_v5 = vor.u32 %v406_v0, %v310_v63  ;;  %v315_v6 = vor.u32 %v405_v1, %v312_v2  ;;  %v404_v8 = vld [vmem:[%s502_s0] sm:$0xff] }
  0x16   :  { %245 = vmatpush.bf16.msra.mxu2 %v367_v35  ;;  %v319_v7 = vor.u32 %v407_v4, %v318_v3  ;;  %v277_v9 = vld [vmem:[%s504_s2] sm:$0x7] }
  0x17   :  { %v279_v10 = vperm.slane %v277_v9, 0  ;;  %v280_v11 = vperm.slane %v277_v9, 1  ;;  %v281_v17 = vperm.slane %v277_v9, 2 }
  0x18   :  { %218 = vmatpush.bf16.msra.mxu0 %v347_v42 }
  0x19   :  { %232 = vmatpush.bf16.msra.mxu1 %v351_v43 }
  0x1a   :  { %246 = vmatpush.bf16.msra.mxu2 %v355_v44 }
  0x1c   :  { %219 = vmatpush.bf16.msra.mxu0 %v335_v51 }
  0x1d   :  { %233 = vmatpush.bf16.msra.mxu1 %v339_v52 }
  0x1e   :  { %247 = vmatpush.bf16.msra.mxu2 %v343_v53 }
  0x20   :  { %220 = vmatpush.bf16.msra.mxu0 %v323_v60 }
  0x21   :  { %234 = vmatpush.bf16.msra.mxu1 %v327_v61 }
  0x22   :  { %248 = vmatpush.bf16.msra.mxu2 %v331_v62 }
  0x24   :  { %221 = vmatpush.bf16.msra.mxu0 %v311_v5 }
  0x25   :  { %235 = vmatpush.bf16.msra.mxu1 %v315_v6 }
  0x26   :  { %249 = vmatpush.bf16.msra.mxu2 %v319_v7 }
  0x27   :  { %222 = vmatmul.bf16.vlgmr.msra.gmra.mxu0 %v404_v8 }
  0x28   :  { %236 = vmatmul.bf16.vlgmr.msra.gmra.mxu1 %v404_v8 }
  0x29   :  { %250 = vmatmul.bf16.vlgmr.msra.gmra.mxu2 %v404_v8 }
  0xa4   :  { %v223_v12 = vpop.f32.mrf.mxu0 }
  0xa5   :  { %v285_v13 = vadd.f32 %v279_v10, %v223_v12  ;;  %v237_v14 = vpop.f32.mrf.mxu1 }
  0xa6   :  { %v286_v15 = vadd.f32 %v280_v11, %v237_v14 }
  0xa8   :  { %v291_v16 = vpack.c.bf16 %v286_v15, %v285_v13 }
  0xaa   :  { %295 = vst [vmem:[%s505_s3] sm:$0xff] %v291_v16 }
  0xac   :  { %v251_v18 = vpop.f32.mrf.mxu2  ;;  %v225_v20 = vpop.f32.mrf.mxu0 }
  0xad   :  { %v287_v19 = vadd.f32 %v281_v17, %v251_v18  ;;  %v288_v21 = vadd.f32 %v279_v10, %v225_v20  ;;  %v239_v22 = vpop.f32.mrf.mxu1 }
  0xae   :  { %v289_v24 = vadd.f32 %v280_v11, %v239_v22 }
  0xaf   :  { %v292_v23 = vpack.c.bf16 %v287_v19, %v287_v19 }
  0xb0   :  { %v293_v25 = vpack.c.bf16 %v289_v24, %v288_v21 }
  0xb1   :  { %296 = vst [vmem:[%s505_s3 + $0x8] sm:$0xf] %v292_v23 }
  0xb2   :  { %297 = vst [vmem:[%s505_s3 + $0xc] sm:$0xff] %v293_v25 }
  0xb4   :  { %v253_v26 = vpop.f32.mrf.mxu2 }
  0xb5   :  { %v290_v27 = vadd.f32 %v281_v17, %v253_v26 }
  0xb7   :  { %v294_v28 = vpack.c.bf16 %v290_v27, %v290_v27 }
  0xb9   :  { %298 = vst [vmem:[%s505_s3 + $0x14] sm:$0xf] %v294_v28 }
  0xba   :  { %303 = vsyncpa [#allocation4], 1 }

// kernel: finbert_regressor.14
= control target key start
LH: loop header
LB: loop body
LE: loop exit
PB: predicated region body
PF: predicated region fallthrough
CT: control target
= control target key end

     0   :  { %s682_s15 = smov 0   ;;  %s684_s16 = smov 0   ;;  %s749_s0 = inlined_call_operand.vmem [shape: bf16[16,384], index: 0, kind: input, shape index: {}, may-alias: {0,1,2}]   ;;  %s750_s1 = inlined_call_operand.vmem [shape: bf16[16,384], index: 1, kind: input, shape index: {}, may-alias: {0,1,2}]   ;;  %s751_s2 = inlined_call_operand.vmem [shape: bf16[16,384], index: 2, kind: input, shape index: {}, may-alias: {0,1,2}]   ;;  %s752_s3 = inlined_call_operand.vmem [shape: f32[2,1,8], index: 3, kind: input, shape index: {}]   ;;  %s753_s4 = inlined_call_operand.vmem [shape: bf16[16,128], index: 4, kind: output, shape index: {}]  }
   0x1   :  { %s686_s17 = smov 0  }
   0x2 LB: > { %s26_s18 = sadd.s32 1, %s650_s16  ;;  %p580_p0 = scmp.ge.s32.totalorder %s654_s17, 1  ;;  %s654_s17 = sphi %s686_s17, %s14_s17   ;;  %s650_s16 = sphi %s684_s16, %s755_s16   ;;  %s646_s15 = sphi %s682_s15, %s754_s15  }
   0x3   : > { %p28_p1 = scmp.ge.s32.totalorder %s26_s18, 2  ;;  %p227_p2 = scmp.lt.s32.totalorder %s654_s17, 3 }
   0x5   : > { %s757_s18 = smov (%p28_p1, %s26_s18), 0  ;;  %p228_p3 = pnand %p580_p0, %p227_p2 }
   0x6   : > { %p279_p4 = scmp.lt.s32.totalorder (!%p228_p3), %s646_s15, 1  ;;  %s656_s27 = smov (!%p228_p3), 64  }
   0x7   : > { %231 = sbr.rel (%p228_p3) target bundleno = 789 (0x315), region = 36 }
   0xc   : > { %s759_s15 = smov (!%p279_p4, %s646_s15), 1  ;;  %vm322_vm0 = vcmask 523264   ;;  %vm347_vm1 = vcmask 64512   ;;  %vm363_vm2 = vcmask 1043456  }
   0xd   : > { %s703_s19 = smul.u32 12, %s759_s15  ;;  %s309_s30 = scalar_lea.vmem %s752_s3, %s759_s15 }
   0xe   : > { %v623_v12 = vld [vmem:[%s309_s30] ss:$0 sm:$0xff]  ;;  %s584_s9 = sshll.u32 %s759_s15, 2 }
   0xf   : > { %s592_s20 = sadd.s32 4, %s703_s19  ;;  %s286_s26 = scalar_lea.vmem %s749_s0, %s703_s19 }
  0x10   : > { %s295_s23 = scalar_lea.vmem %s750_s1, %s592_s20  ;;  %v319_v2 = vld [vmem:[%s286_s26] sm:$0xf]  ;;  %s594_s5 = sadd.s32 8, %s703_s19 }
  0x11   : > { %v320_v0 = vld [vmem:[%s295_s23] sm:$0xf]  ;;  %v381_v4 = vunpack.c.l.b16 %v319_v2  ;;  %s305_s8 = scalar_lea.vmem %s751_s2, %s594_s5  ;;  %s316_s12 = scalar_lea.vmem %s753_s4, %s584_s9 }
  0x12   : > { %v386_v1 = vunpack.c.l.b16 %v320_v0  ;;  %v327_v6 = vsel %vm322_vm0, %v320_v0, 0  ;;  %v321_v31 = vld [vmem:[%s305_s8] sm:$0xf] }
  0x13   : > { %v382_v5 = vpack.c.b16 %v381_v4, %v381_v4  ;;  %336 = vmatpush.bf16.xpose.msra.mxu0 %v327_v6  ;;  %v424_v32 = vunpack.c.l.b16 %v321_v31  ;;  %v365_v34 = vsel %vm363_vm2, %v321_v31, 0 }
  0x14   : > { %v387_v3 = vpack.c.b16 %v386_v1, %v386_v1  ;;  %374 = vmatpush.bf16.msra.mxu1 %v365_v34 }
  0x15   : > { %v425_v33 = vpack.c.b16 %v424_v32, %v424_v32 }
  0x16   : > { %388 = vrot.lane.b32.xlu0 %v387_v3, %s656_s27 }
  0x1a   : > { %585 = vmatmul.msk.bf16.vlgmr.msra.gmra.mxu0 %vm322_vm0, %v319_v2 }
  0x1e   : > { %383 = vrot.lane.b32.xlu0 %v382_v5, %s656_s27 }
  0x88   : > { %v389_v7 = vpop.permute.xlu0 %388 }
  0x89   : > { %v394_v8 = vsel %vm322_vm0, %v389_v7, 0 }
  0x8a   : > { %403 = vmatpush.bf16.xpose.msra.mxu2 %v394_v8 }
  0x90   : > { %v384_v9 = vpop.permute.xlu0 %383 }
  0x91   : > { %587 = vmatmul.msk.bf16.vlgmr.msra.gmra.mxu2 %vm322_vm0, %v384_v9 }
  0x97   : > { %v338_v10 = vpop.f32.mrf.mxu0 }
  0x98   : > { %v342_v16 = vmul.f32 0.125, %v338_v10 }
  0x9a   : > { %v346_v18 = vadd.f32 %v623_v12, %v342_v16 }
  0x9c   : > { %v348_v20 = vsel %vm347_vm1, %v346_v18, -inf }
  0x9f   : > { %v340_v11 = vpop.f32.mrf.mxu0 }
 0x114   : > { %v405_v13 = vpop.f32.mrf.mxu2 }
 0x115   : > { %v409_v14 = vmul.f32 0.125, %v405_v13 }
 0x117   : > { %v410_v15 = vadd.f32 %v623_v12, %v409_v14 }
 0x119   : > { %v411_v17 = vsel %vm347_vm1, %v410_v15, -inf }
 0x11a   : > { %412 = vmax.xlane.f32.xlu1 %v411_v17 }
 0x11c   : > { %v407_v19 = vpop.f32.mrf.mxu2 }
 0x122   : > { %349 = vmax.xlane.f32.xlu1 %v348_v20 }
 0x18d   : > { %v413_v21 = vpop.xlane.xlu1 %412 }
 0x18e   : > { %v414_v22 = vsub.f32 %v410_v15, %v413_v21 }
 0x190   : > { %v415_v23 = vmul.f32 1.442695, %v414_v22 }
 0x192   : > { %624 = vpow2.f32 %v415_v23 }
 0x195   : > { %v350_v24 = vpop.xlane.xlu1 %349 }
 0x196   : > { %v351_v25 = vsub.f32 %v346_v18, %v350_v24 }
 0x198   : > { %v625_v26 = vpop.eup %624  ;;  %v352_v27 = vmul.f32 1.442695, %v351_v25 }
 0x199   : > { %v417_v28 = vsel %vm347_vm1, %v625_v26, 0.0 }
 0x19a   : > { %626 = vpow2.f32 %v352_v27  ;;  %418 = vadd.xlane.f32.xlu2 %v417_v28 }
 0x1a0   : > { %v627_v29 = vpop.eup %626 }
 0x1a1   : > { %v354_v30 = vsel %vm347_vm1, %v627_v29, 0.0 }
 0x1a2   : > { %355 = vadd.xlane.f32.xlu0 %v354_v30 }
 0x1b2   : > { %426 = vrot.lane.b32.xlu2 %v425_v33, %s656_s27 }
 0x20d   : > { %v419_v35 = vpop.xlane.xlu2 %418 }
 0x20e   : > { %628 = vrcp.f32 %v419_v35 }
 0x214   : > { %v629_v36 = vpop.eup %628 }
 0x215   : > { %v427_v37 = vpop.permute.xlu2 %426  ;;  %v356_v38 = vpop.xlane.xlu0 %355  ;;  %v421_v39 = vmul.f32 %v629_v36, %v625_v26 }
 0x216   : > { %630 = vrcp.f32 %v356_v38  ;;  %v432_v40 = vsel %vm363_vm2, %v427_v37, 0 }
 0x217   : > { %441 = vmatpush.bf16.msra.mxu3 %v432_v40  ;;  %v422_v41 = vpack.c.bf16 %v421_v39, %v421_v39 }
 0x21a   : > { %588 = vmatmul.msk.bf16.vlgmr.msra.gmra.mxu3 %vm347_vm1, %v422_v41 }
 0x21c   : > { %v631_v42 = vpop.eup %630 }
 0x21d   : > { %v358_v43 = vmul.f32 %v631_v42, %v627_v29 }
 0x21f   : > { %v359_v44 = vpack.c.bf16 %v358_v43, %v358_v43 }
 0x221   : > { %586 = vmatmul.msk.bf16.vlgmr.msra.gmra.mxu1 %vm347_vm1, %v359_v44 }
 0x29d   : > { %v443_v45 = vpop.f32.mrf.mxu3 }
 0x29e   : > { %448 = vrot.lane.b32.xlu1 %v443_v45, %s656_s27  ;;  %v376_v46 = vpop.f32.mrf.mxu1 }
 0x2a5   : > { %v445_v47 = vpop.f32.mrf.mxu3 }
 0x2a6   : > { %v378_v48 = vpop.f32.mrf.mxu1 }
 0x310   : > { %v449_v49 = vpop.permute.xlu1 %448 }
 0x311   : > { %v451_v50 = vsel %vm322_vm0, %v376_v46, %v449_v49 }
 0x312   : > { %v452_v51 = vpack.c.bf16 %v451_v50, %v451_v50 }
 0x314   : > { %453 = vst [vmem:[%s316_s12] sm:$0xf] %v452_v51 }
 0x315 PF: > { %s14_s17 = sadd.s32 1, %s654_s17   ;;  %s754_s15 = smov %s650_s16 }
 0x316   : > { %p11_p5 = scmp.ge.s32.totalorder %s14_s17, 4   ;;  %s755_s16 = smov %s757_s18 }
 0x318   :  { %13 = sbr.rel (!%p11_p5) target bundleno = 2 (0x2), region = 75 }

// kernel: finbert_regressor.15
= control target key start
LH: loop header
LB: loop body
LE: loop exit
PB: predicated region body
PF: predicated region fallthrough
CT: control target
= control target key end

     0   :  { %v269_v19 = vmov 128.0   ;;  %s347_s1 = inlined_call_operand.vmem [shape: bf16[128,128], index: 1, kind: input, shape index: {}]   ;;  %s348_s2 = inlined_call_operand.vmem [shape: f32[1,128], index: 2, kind: input, shape index: {}]   ;;  %s349_s0 = inlined_call_operand.vmem [shape: bf16[16,128], index: 0, kind: input, shape index: {}]   ;;  %s350_s3 = inlined_call_operand.vmem [shape: bf16[16,128], index: 3, kind: input, shape index: {}]   ;;  %s351_s4 = inlined_call_operand.vmem [shape: f32[1,128], index: 4, kind: input, shape index: {}]   ;;  %s352_s5 = inlined_call_operand.vmem [shape: f32[1,128], index: 5, kind: input, shape index: {}]   ;;  %s353_s6 = inlined_call_operand.vmem [shape: bf16[16,128], index: 6, kind: output, shape index: {}]  }
   0x1   :  { %v249_v0 = vld [vmem:[%s347_s1 + $0x38] sm:$0xff]  ;;  %v248_v1 = vld [vmem:[%s347_s1 + $0x30] sm:$0xff]  ;;  %v247_v2 = vld [vmem:[%s347_s1 + $0x28] sm:$0xff]  ;;  %263 = vrcp.f32 %v269_v19 }
   0x2   :  { %103 = vmatpush.bf16.msra.mxu0 %v249_v0  ;;  %v246_v3 = vld [vmem:[%s347_s1 + $0x20] sm:$0xff]  ;;  %v245_v4 = vld [vmem:[%s347_s1 + $0x18] sm:$0xff]  ;;  %v244_v5 = vld [vmem:[%s347_s1 + $0x10] sm:$0xff] }
   0x3   :  { %v243_v6 = vld [vmem:[%s347_s1 + $0x8] sm:$0xff]  ;;  %v242_v7 = vld [vmem:[%s347_s1] sm:$0xff] }
   0x4   :  { %v241_v8 = vld [vmem:[%s349_s0] sm:$0xff] }
   0x5   :  { %v251_v9 = vld [vmem:[%s350_s3] sm:$0xff]  }
   0x6   :  { %104 = vmatpush.bf16.msra.mxu0 %v248_v1  ;;  %v260_v10 = vld [vmem:[%s348_s2] ss:$0 sm:$0xff]  ;;  %v252_v11 = vunpack.c.l.bf16 %v251_v9  ;;  %v253_v15 = vunpack.c.h.bf16 %v251_v9 }
   0x7   :  { %v264_v20 = vpop.eup %263  ;;  %v261_v52 = vld [vmem:[%s351_s4] ss:$0 sm:$0xff] }
   0x8   :  { %v143_v21 = vmul.f32 128.0, %v264_v20  ;;  %vm147_vm0 = vweird.f32 %v264_v20  ;;  %v262_v56 = vld [vmem:[%s352_s5] ss:$0 sm:$0xff] }
   0xa   :  { %105 = vmatpush.bf16.msra.mxu0 %v247_v2  ;;  %v144_v22 = vsub.f32 1.0, %v143_v21 }
   0xc   :  { %v145_v23 = vmul.f32 %v264_v20, %v144_v22 }
   0xe   :  { %106 = vmatpush.bf16.msra.mxu0 %v246_v3  ;;  %v146_v24 = vadd.f32 %v264_v20, %v145_v23 }
  0x10   :  { %v148_v25 = vsel %vm147_vm0, %v264_v20, %v146_v24 }
  0x12   :  { %107 = vmatpush.bf16.msra.mxu0 %v245_v4 }
  0x16   :  { %108 = vmatpush.bf16.msra.mxu0 %v244_v5 }
  0x1a   :  { %109 = vmatpush.bf16.msra.mxu0 %v243_v6 }
  0x1e   :  { %110 = vmatpush.bf16.msra.mxu0 %v242_v7 }
  0x21   :  { %111 = vmatmul.bf16.vlgmr.msra.gmra.mxu0 %v241_v8 }
  0x9e   :  { %v112_v12 = vpop.f32.mrf.mxu0 }
  0x9f   :  { %v130_v13 = vadd.f32 %v260_v10, %v112_v12 }
  0xa1   :  { %v136_v14 = vadd.f32 %v252_v11, %v130_v13 }
  0xa3   :  { %138 = vadd.xlane.f32.xlu0 %v136_v14 }
  0xa6   :  { %v114_v16 = vpop.f32.mrf.mxu0 }
  0xa7   :  { %v131_v17 = vadd.f32 %v260_v10, %v114_v16 }
  0xa9   :  { %v137_v18 = vadd.f32 %v253_v15, %v131_v17 }
  0xab   :  { %140 = vadd.xlane.f32.xlu0 %v137_v18 }
 0x116   :  { %v139_v26 = vpop.xlane.xlu0 %138 }
 0x117   :  { %v149_v27 = vmul.f32 %v148_v25, %v139_v26 }
 0x119   :  { %v151_v28 = vsub.f32 %v136_v14, %v149_v27 }
 0x11b   :  { %v153_v29 = vmul.f32 %v151_v28, %v151_v28 }
 0x11d   :  { %155 = vadd.xlane.f32.xlu1 %v153_v29 }
 0x11e   :  { %v141_v30 = vpop.xlane.xlu0 %140 }
 0x11f   :  { %v150_v31 = vmul.f32 %v148_v25, %v141_v30 }
 0x121   :  { %v152_v32 = vsub.f32 %v137_v18, %v150_v31 }
 0x123   :  { %v154_v33 = vmul.f32 %v152_v32, %v152_v32 }
 0x125   :  { %157 = vadd.xlane.f32.xlu1 %v154_v33 }
 0x190   :  { %v156_v34 = vpop.xlane.xlu1 %155 }
 0x191   :  { %v159_v35 = vmul.f32 %v156_v34, %v148_v25 }
 0x193   :  { %v161_v36 = vadd.f32 1e-12, %v159_v35 }
 0x195   :  { %265 = vrsqrt.f32 %v161_v36  ;;  %vm169_vm2 = vweird.f32 %v161_v36 }
 0x198   :  { %v158_v37 = vpop.xlane.xlu1 %157 }
 0x199   :  { %v160_v38 = vmul.f32 %v158_v37, %v148_v25 }
 0x19b   :  { %v266_v39 = vpop.eup %265  ;;  %v162_v40 = vadd.f32 1e-12, %v160_v38 }
 0x19c   :  { %v164_v41 = vmul.f32 %v266_v39, %v161_v36  ;;  %vm170_vm1 = vweird.f32 %v266_v39 }
 0x19d   :  { %267 = vrsqrt.f32 %v162_v40  ;;  %vm171_vm3 = vmor %vm169_vm2, %vm170_vm1  ;;  %vm179_vm5 = vweird.f32 %v162_v40 }
 0x19e   :  { %v165_v42 = vmul.f32 %v266_v39, %v164_v41 }
 0x1a0   :  { %v166_v43 = vmul.f32 0.5, %v165_v42 }
 0x1a2   :  { %v167_v44 = vsub.f32 1.5, %v166_v43 }
 0x1a3   :  { %v268_v45 = vpop.eup %267 }
 0x1a4   :  { %v168_v46 = vmul.f32 %v266_v39, %v167_v44  ;;  %v174_v47 = vmul.f32 %v268_v45, %v162_v40  ;;  %vm180_vm4 = vweird.f32 %v268_v45 }
 0x1a5   :  { %vm181_vm6 = vmor %vm179_vm5, %vm180_vm4 }
 0x1a6   :  { %v175_v48 = vmul.f32 %v268_v45, %v174_v47  ;;  %v172_v49 = vsel %vm171_vm3, %v266_v39, %v168_v46 }
 0x1a7   :  { %v183_v53 = vmul.f32 %v172_v49, %v151_v28 }
 0x1a8   :  { %v176_v50 = vmul.f32 0.5, %v175_v48 }
 0x1a9   :  { %v189_v57 = vmul.f32 %v261_v52, %v183_v53 }
 0x1aa   :  { %v177_v51 = vsub.f32 1.5, %v176_v50 }
 0x1ab   :  { %v195_v60 = vadd.f32 %v262_v56, %v189_v57 }
 0x1ac   :  { %v178_v54 = vmul.f32 %v268_v45, %v177_v51 }
 0x1ae   :  { %v182_v55 = vsel %vm181_vm6, %v268_v45, %v178_v54 }
 0x1af   :  { %v184_v58 = vmul.f32 %v182_v55, %v152_v32 }
 0x1b1   :  { %v190_v59 = vmul.f32 %v261_v52, %v184_v58 }
 0x1b3   :  { %v196_v61 = vadd.f32 %v262_v56, %v190_v59 }
 0x1b5   :  { %v257_v62 = vpack.c.bf16 %v196_v61, %v195_v60 }
 0x1b7   :  { %258 = vst [vmem:[%s353_s6] sm:$0xff] %v257_v62  }

// kernel: finbert_regressor.16
= control target key start
LH: loop header
LB: loop body
LE: loop exit
PB: predicated region body
PF: predicated region fallthrough
CT: control target
= control target key end

     0   :  { %8 = vsyncpa [#allocation4], 0  ;;  %s510_s15 = smov [#allocation3]   ;;  %s511_s17 = smov 128   ;;  %s621_s0 = inlined_call_operand.vmem [shape: bf16[16,128], index: 0, kind: input, shape index: {}]   ;;  %s622_s1 = inlined_call_operand.hbm [shape: bf16[128,256], index: 1, kind: input, shape index: {}]   ;;  %s623_s2 = inlined_call_operand.vmem [shape: f32[1,256], index: 2, kind: input, shape index: {}]   ;;  %s624_s3 = inlined_call_operand.vmem [shape: bf16[16,256], index: 3, kind: output, shape index: {}]  }
   0x1   :  { %s15_s14 = sshll.u32 %s622_s1, 4  ;;  %s17_s16 = sshll.u32 %s510_s15, 4  ;;  %s16_s14 = int_to_ptr.hbm [resolvable:$true] %s15_s14  ;;  %s18_s16 = int_to_ptr.vmem [resolvable:$true] %s17_s16 }
   0x2   :  { %s512_s18 = smov 8  }
   0x3   :  { %23 = dma.hbm_to_vmem [thread:$0]  %s16_s14, 2048, %s18_s16, [#allocation4], %s511_s17, %s511_s17, %s512_s18  }
   0x4   :  { %508 = dma.done.wait [#allocation4], 2048  }
   0x5   :  { %509 = vsyncadd [#allocation4], 4294965248  ;;  %v446_v0 = vld [vmem:[#allocation3 + $0x70] sm:$0xf]  ;;  %v472_v1 = vld [vmem:[#allocation3 + $0x74] sm:$0xf0] }
   0x6   :  { %v471_v2 = vld [vmem:[#allocation3 + $0x74] sm:$0xf]  ;;  %v447_v3 = vor.u32 %v472_v1, %v446_v0  ;;  %v448_v4 = vld [vmem:[#allocation3 + $0x78] sm:$0xf0]  ;;  %v438_v5 = vld [vmem:[#allocation3 + $0x60] sm:$0xf] }
   0x7   :  { %v470_v6 = vld [vmem:[#allocation3 + $0x64] sm:$0xf0]  ;;  %v451_v7 = vor.u32 %v471_v2, %v448_v4  ;;  %v469_v8 = vld [vmem:[#allocation3 + $0x64] sm:$0xf]  ;;  %v440_v9 = vld [vmem:[#allocation3 + $0x68] sm:$0xf0] }
   0x8   :  { %146 = vmatpush.bf16.msra.mxu0 %v447_v3  ;;  %v439_v10 = vor.u32 %v470_v6, %v438_v5  ;;  %v443_v11 = vor.u32 %v469_v8, %v440_v9  ;;  %v430_v12 = vld [vmem:[#allocation3 + $0x50] sm:$0xf]  ;;  %v468_v13 = vld [vmem:[#allocation3 + $0x54] sm:$0xf0]  ;;  %v467_v14 = vld [vmem:[#allocation3 + $0x54] sm:$0xf] }
   0x9   :  { %160 = vmatpush.bf16.msra.mxu1 %v451_v7  ;;  %v432_v15 = vld [vmem:[#allocation3 + $0x58] sm:$0xf0]  ;;  %v431_v16 = vor.u32 %v468_v13, %v430_v12  ;;  %v422_v18 = vld [vmem:[#allocation3 + $0x40] sm:$0xf]  ;;  %v466_v19 = vld [vmem:[#allocation3 + $0x44] sm:$0xf0] }
   0xa   :  { %v435_v17 = vor.u32 %v467_v14, %v432_v15  ;;  %v465_v20 = vld [vmem:[#allocation3 + $0x44] sm:$0xf]  ;;  %v424_v21 = vld [vmem:[#allocation3 + $0x48] sm:$0xf0]  ;;  %v423_v22 = vor.u32 %v466_v19, %v422_v18  ;;  %v414_v24 = vld [vmem:[#allocation3 + $0x30] sm:$0xf] }
   0xb   :  { %v427_v23 = vor.u32 %v465_v20, %v424_v21  ;;  %v464_v25 = vld [vmem:[#allocation3 + $0x34] sm:$0xf0]  ;;  %v463_v26 = vld [vmem:[#allocation3 + $0x34] sm:$0xf]  ;;  %v416_v27 = vld [vmem:[#allocation3 + $0x38] sm:$0xf0] }
   0xc   :  { %147 = vmatpush.bf16.msra.mxu0 %v439_v10  ;;  %v415_v28 = vor.u32 %v464_v25, %v414_v24  ;;  %v419_v29 = vor.u32 %v463_v26, %v416_v27  ;;  %v406_v30 = vld [vmem:[#allocation3 + $0x20] sm:$0xf]  ;;  %v462_v31 = vld [vmem:[#allocation3 + $0x24] sm:$0xf0]  ;;  %v461_v32 = vld [vmem:[#allocation3 + $0x24] sm:$0xf] }
   0xd   :  { %161 = vmatpush.bf16.msra.mxu1 %v443_v11  ;;  %v408_v33 = vld [vmem:[#allocation3 + $0x28] sm:$0xf0]  ;;  %v407_v34 = vor.u32 %v462_v31, %v406_v30  ;;  %v398_v36 = vld [vmem:[#allocation3 + $0x10] sm:$0xf]  ;;  %v460_v37 = vld [vmem:[#allocation3 + $0x14] sm:$0xf0] }
   0xe   :  { %v411_v35 = vor.u32 %v461_v32, %v408_v33  ;;  %v459_v38 = vld [vmem:[#allocation3 + $0x14] sm:$0xf]  ;;  %v400_v39 = vld [vmem:[#allocation3 + $0x18] sm:$0xf0]  ;;  %v399_v40 = vor.u32 %v460_v37, %v398_v36  ;;  %v390_v42 = vld [vmem:[#allocation3] sm:$0xf] }
   0xf   :  { %v403_v41 = vor.u32 %v459_v38, %v400_v39  ;;  %v458_v43 = vld [vmem:[#allocation3 + $0x4] sm:$0xf0]  ;;  %v457_v44 = vld [vmem:[#allocation3 + $0x4] sm:$0xf]  ;;  %v392_v45 = vld [vmem:[#allocation3 + $0x8] sm:$0xf0] }
  0x10   :  { %148 = vmatpush.bf16.msra.mxu0 %v431_v16  ;;  %v391_v46 = vor.u32 %v458_v43, %v390_v42  ;;  %v395_v47 = vor.u32 %v457_v44, %v392_v45  ;;  %v456_v48 = vld [vmem:[%s621_s0] sm:$0xff] }
  0x11   :  { %162 = vmatpush.bf16.msra.mxu1 %v435_v17  ;;  %v189_v49 = vld [vmem:[%s623_s2] sm:$0x3] }
  0x12   :  { %v191_v50 = vperm.slane %v189_v49, 0  ;;  %v192_v51 = vperm.slane %v189_v49, 1 }
  0x14   :  { %149 = vmatpush.bf16.msra.mxu0 %v423_v22 }
  0x15   :  { %163 = vmatpush.bf16.msra.mxu1 %v427_v23 }
  0x18   :  { %150 = vmatpush.bf16.msra.mxu0 %v415_v28 }
  0x19   :  { %164 = vmatpush.bf16.msra.mxu1 %v419_v29 }
  0x1c   :  { %151 = vmatpush.bf16.msra.mxu0 %v407_v34 }
  0x1d   :  { %165 = vmatpush.bf16.msra.mxu1 %v411_v35 }
  0x20   :  { %152 = vmatpush.bf16.msra.mxu0 %v399_v40 }
  0x21   :  { %166 = vmatpush.bf16.msra.mxu1 %v403_v41 }
  0x24   :  { %153 = vmatpush.bf16.msra.mxu0 %v391_v46 }
  0x25   :  { %167 = vmatpush.bf16.msra.mxu1 %v395_v47 }
  0x27   :  { %154 = vmatmul.bf16.vlgmr.msra.gmra.mxu0 %v456_v48 }
  0x28   :  { %168 = vmatmul.bf16.vlgmr.msra.gmra.mxu1 %v456_v48 }
  0xa4   :  { %v155_v52 = vpop.f32.mrf.mxu0 }
  0xa5   :  { %v542_v53 = vadd.f32 %v191_v50, %v155_v52  ;;  %v169_v54 = vpop.f32.mrf.mxu1 }
  0xa6   :  { %v544_v55 = vadd.f32 %v192_v51, %v169_v54 }
  0xa7   :  { %v547_v56 = vmul.f32 0.70710677, %v542_v53 }
  0xa8   :  { %v550_v57 = vmul.f32 0.70710677, %v544_v55 }
  0xa9   :  { %v207_v58 = vmul.f32 %v547_v56, %v547_v56 }
  0xaa   :  { %v247_v59 = vmul.f32 %v550_v57, %v550_v57 }
  0xab   :  { %v208_v60 = vmin.f32 %v207_v58, 16.0 }
  0xac   :  { %v556_v61 = vmin.f32 %v247_v59, 16.0  ;;  %v157_v62 = vpop.f32.mrf.mxu0 }
  0xad   :  { %v209_v63 = vmul.f32 2.1237322e-06, %v208_v60  ;;  %v220_v0 = vmul.f32 3.8918573e-05, %v208_v60  ;;  %v558_v1 = vadd.f32 %v191_v50, %v157_v62  ;;  %v171_v2 = vpop.f32.mrf.mxu1 }
  0xae   :  { %v249_v3 = vmul.f32 2.1237322e-06, %v556_v61  ;;  %v260_v4 = vmul.f32 3.8918573e-05, %v556_v61  ;;  %v562_v5 = vadd.f32 %v192_v51, %v171_v2 }
  0xaf   :  { %v210_v6 = vadd.f32 0.00028619796, %v209_v63  ;;  %v221_v7 = vadd.f32 0.001143296, %v220_v0  ;;  %v565_v10 = vmul.f32 0.70710677, %v558_v1 }
  0xb0   :  { %v250_v8 = vadd.f32 0.00028619796, %v249_v3  ;;  %v261_v9 = vadd.f32 0.001143296, %v260_v4  ;;  %v568_v13 = vmul.f32 0.70710677, %v562_v5 }
  0xb1   :  { %v211_v11 = vmul.f32 %v210_v6, %v208_v60  ;;  %v222_v12 = vmul.f32 %v221_v7, %v208_v60  ;;  %v287_v16 = vmul.f32 %v565_v10, %v565_v10 }
  0xb2   :  { %v251_v14 = vmul.f32 %v250_v8, %v556_v61  ;;  %v262_v15 = vmul.f32 %v261_v9, %v556_v61  ;;  %v327_v19 = vmul.f32 %v568_v13, %v568_v13 }
  0xb3   :  { %v212_v17 = vadd.f32 0.0036580483, %v211_v11  ;;  %v223_v18 = vadd.f32 0.014752088, %v222_v12  ;;  %v576_v22 = vmin.f32 %v287_v16, 16.0 }
  0xb4   :  { %v252_v20 = vadd.f32 0.0036580483, %v251_v14  ;;  %v263_v21 = vadd.f32 0.014752088, %v262_v15  ;;  %v578_v25 = vmin.f32 %v327_v19, 16.0 }
  0xb5   :  { %v213_v23 = vmul.f32 %v212_v17, %v208_v60  ;;  %v224_v24 = vmul.f32 %v223_v18, %v208_v60  ;;  %v289_v28 = vmul.f32 2.1237322e-06, %v576_v22  ;;  %v300_v29 = vmul.f32 3.8918573e-05, %v576_v22 }
  0xb6   :  { %v253_v26 = vmul.f32 %v252_v20, %v556_v61  ;;  %v264_v27 = vmul.f32 %v263_v21, %v556_v61  ;;  %v329_v32 = vmul.f32 2.1237322e-06, %v578_v25  ;;  %v340_v40 = vmul.f32 3.8918573e-05, %v578_v25 }
  0xb7   :  { %v214_v30 = vadd.f32 0.05243302, %v213_v23  ;;  %v225_v31 = vadd.f32 0.112945676, %v224_v24  ;;  %v290_v35 = vadd.f32 0.00028619796, %v289_v28 }
  0xb8   :  { %v254_v33 = vadd.f32 0.05243302, %v253_v26  ;;  %v265_v34 = vadd.f32 0.112945676, %v264_v27  ;;  %v301_v38 = vadd.f32 0.001143296, %v300_v29 }
  0xb9   :  { %v215_v36 = vmul.f32 %v214_v30, %v208_v60  ;;  %v226_v37 = vmul.f32 %v225_v31, %v208_v60  ;;  %v291_v42 = vmul.f32 %v290_v35, %v576_v22  ;;  %v330_v46 = vadd.f32 0.00028619796, %v329_v32 }
  0xba   :  { %v266_v39 = vmul.f32 %v265_v34, %v556_v61  ;;  %v302_v43 = vmul.f32 %v301_v38, %v576_v22  ;;  %v255_v44 = vmul.f32 %v254_v33, %v556_v61  ;;  %v341_v51 = vadd.f32 0.001143296, %v340_v40 }
  0xbb   :  { %v227_v41 = vadd.f32 0.4994258, %v226_v37  ;;  %v216_v47 = vadd.f32 0.18741608, %v215_v36  ;;  %v292_v54 = vadd.f32 0.0036580483, %v291_v42  ;;  %v331_v63 = vmul.f32 %v330_v46, %v578_v25 }
  0xbc   :  { %v267_v45 = vadd.f32 0.4994258, %v266_v39  ;;  %v303_v49 = vadd.f32 0.014752088, %v302_v43  ;;  %v256_v58 = vadd.f32 0.18741608, %v255_v44  ;;  %v342_v2 = vmul.f32 %v341_v51, %v578_v25 }
  0xbd   :  { %v228_v48 = vmul.f32 %v227_v41, %v208_v60  ;;  %v217_v0 = vmul.f32 %v216_v47, %v208_v60  ;;  %v293_v3 = vmul.f32 %v292_v54, %v576_v22  ;;  %v332_v7 = vadd.f32 0.0036580483, %v331_v63 }
  0xbe   :  { %v268_v50 = vmul.f32 %v267_v45, %v556_v61  ;;  %v304_v62 = vmul.f32 %v303_v49, %v576_v22  ;;  %v257_v4 = vmul.f32 %v256_v58, %v556_v61  ;;  %v343_v9 = vadd.f32 0.014752088, %v342_v2 }
  0xbf   :  { %v229_v52 = vadd.f32 1.0, %v228_v48  ;;  %v218_v8 = vadd.f32 1.1283791, %v217_v0  ;;  %v294_v14 = vadd.f32 0.05243302, %v293_v3  ;;  %v333_v19 = vmul.f32 %v332_v7, %v578_v25 }
  0xc0   :  { %v269_v59 = vadd.f32 1.0, %v268_v50  ;;  %v305_v6 = vadd.f32 0.112945676, %v304_v62  ;;  %v344_v15 = vmul.f32 %v343_v9, %v578_v25  ;;  %v258_v17 = vadd.f32 1.1283791, %v257_v4 }
  0xc1   :  { %476 = vrcp.f32 %v229_v52  ;;  %v219_v20 = vmul.f32 %v218_v8, %v547_v56  ;;  %vm235_vm0 = vweird.f32 %v229_v52  ;;  %v239_v24 = vand.u32 2147483647, %v229_v52 }
  0xc2   :  { %478 = vrcp.f32 %v269_v59  ;;  %v306_v11 = vmul.f32 %v305_v6, %v576_v22  ;;  %v345_v21 = vadd.f32 0.112945676, %v344_v15  ;;  %v241_v26 = vand.u32 2147483648, %v229_v52 }
  0xc3   :  { %v281_v29 = vand.u32 2147483648, %v269_v59  ;;  %v295_v30 = vmul.f32 %v294_v14, %v576_v22  ;;  %v334_v34 = vadd.f32 0.05243302, %v333_v19  ;;  %v279_v56 = vand.u32 2147483647, %v269_v59 }
  0xc4   :  { %v307_v18 = vadd.f32 0.4994258, %v306_v11  ;;  %v346_v31 = vmul.f32 %v345_v21, %v578_v25  ;;  %v259_v38 = vmul.f32 %v258_v17, %v550_v57  ;;  %vm275_vm3 = vweird.f32 %v269_v59 }
  0xc5   :  { %vm240_vm5 = vcmp.eq.f32.partialorder %v239_v24, 8.507059e+37  ;;  %v242_v39 = vor.u32 1.1754944e-38, %v241_v26  ;;  %v282_v43 = vor.u32 1.1754944e-38, %v281_v29  ;;  %v296_v44 = vadd.f32 0.18741608, %v295_v30 }
  0xc6   :  { %v308_v27 = vmul.f32 %v307_v18, %v576_v22  ;;  %v347_v36 = vadd.f32 0.4994258, %v346_v31  ;;  %v335_v45 = vmul.f32 %v334_v34, %v578_v25  ;;  %vm280_vm7 = vcmp.eq.f32.partialorder %v279_v56, 8.507059e+37 }
  0xc7   :  { %v477_v12 = vpop.eup %476  ;;  %v297_v54 = vmul.f32 %v296_v44, %v576_v22  ;;  %v199_v63 = vmul.f32 0.5, %v542_v53  ;;  %v200_v2 = vmul.f32 0.5, %v544_v55 }
  0xc8   :  { %v479_v16 = vpop.eup %478  ;;  %v231_v60 = vmul.f32 %v477_v12, %v229_v52  ;;  %vm236_vm1 = vweird.f32 %v477_v12  ;;  %v309_v33 = vadd.f32 1.0, %v308_v27  ;;  %v348_v41 = vmul.f32 %v347_v36, %v578_v25 }
  0xc9   :  { %v271_v61 = vmul.f32 %v479_v16, %v269_v59  ;;  %vm276_vm2 = vweird.f32 %v479_v16  ;;  %vm237_vm4 = vmor %vm235_vm0, %vm236_vm1  ;;  %v336_v58 = vadd.f32 0.18741608, %v335_v45  ;;  %v298_v7 = vadd.f32 1.1283791, %v297_v54 }
  0xca   :  { %v232_v23 = vsub.f32 1.0, %v231_v60  ;;  %480 = vrcp.f32 %v309_v33  ;;  %vm277_vm6 = vmor %vm275_vm3, %vm276_vm2  ;;  %v349_v48 = vadd.f32 1.0, %v348_v41  ;;  %v321_v8 = vand.u32 2147483648, %v309_v33 }
  0xcb   :  { %v272_v28 = vsub.f32 1.0, %v271_v61  ;;  %v337_v9 = vmul.f32 %v336_v58, %v578_v25  ;;  %v319_v22 = vand.u32 2147483647, %v309_v33  ;;  %vm315_vm9 = vweird.f32 %v309_v33 }
  0xcc   :  { %v233_v32 = vmul.f32 %v477_v12, %v232_v23  ;;  %482 = vrcp.f32 %v349_v48  ;;  %v299_v53 = vmul.f32 %v298_v7, %v565_v10  ;;  %v322_v55 = vor.u32 1.1754944e-38, %v321_v8 }
  0xcd   :  { %v273_v35 = vmul.f32 %v479_v16, %v272_v28  ;;  %vm320_vm11 = vcmp.eq.f32.partialorder %v319_v22, 8.507059e+37  ;;  %v338_v25 = vadd.f32 1.1283791, %v337_v9  ;;  %v361_v19 = vand.u32 2147483648, %v349_v48 }
  0xce   :  { %v234_v37 = vadd.f32 %v477_v12, %v233_v32  ;;  %v359_v21 = vand.u32 2147483647, %v349_v48  ;;  %vm355_vm13 = vweird.f32 %v349_v48  ;;  %v201_v32 = vmul.f32 0.5, %v558_v1 }
  0xcf   :  { %v274_v40 = vadd.f32 %v479_v16, %v273_v35  ;;  %v362_v10 = vor.u32 1.1754944e-38, %v361_v19  ;;  %v339_v27 = vmul.f32 %v338_v25, %v568_v13  ;;  %v202_v35 = vmul.f32 0.5, %v562_v5 }
  0xd0   :  { %v238_v42 = vsel %vm237_vm4, %v477_v12, %v234_v37  ;;  %v481_v51 = vpop.eup %480  ;;  %vm360_vm15 = vcmp.eq.f32.partialorder %v359_v21, 8.507059e+37 }
  0xd1   :  { %v243_v46 = vsel %vm240_vm5, %v242_v39, %v238_v42  ;;  %v278_v47 = vsel %vm277_vm6, %v479_v16, %v274_v40  ;;  %v311_v62 = vmul.f32 %v481_v51, %v309_v33  ;;  %vm316_vm8 = vweird.f32 %v481_v51 }
  0xd2   :  { %v244_v57 = vmul.f32 %v243_v46, %v219_v20  ;;  %v283_v49 = vsel %vm280_vm7, %v282_v43, %v278_v47  ;;  %v483_v11 = vpop.eup %482  ;;  %vm317_vm10 = vmor %vm315_vm9, %vm316_vm8 }
  0xd3   :  { %v284_v50 = vmul.f32 %v283_v49, %v259_v38  ;;  %v312_v4 = vsub.f32 1.0, %v311_v62  ;;  %v351_v15 = vmul.f32 %v483_v11, %v349_v48  ;;  %vm356_vm12 = vweird.f32 %v483_v11 }
  0xd4   :  { %v452_v52 = vclamps-f32 %v244_v57, 1.0  ;;  %vm357_vm14 = vmor %vm355_vm13, %vm356_vm12 }
  0xd5   :  { %v453_v59 = vclamps-f32 %v284_v50, 1.0  ;;  %v313_v14 = vmul.f32 %v481_v51, %v312_v4  ;;  %v352_v17 = vsub.f32 1.0, %v351_v15 }
  0xd6   :  { %v367_v0 = vadd.f32 1.0, %v452_v52 }
  0xd7   :  { %v368_v3 = vadd.f32 1.0, %v453_v59  ;;  %v314_v60 = vadd.f32 %v481_v51, %v313_v14  ;;  %v353_v61 = vmul.f32 %v483_v11, %v352_v17 }
  0xd8   :  { %v371_v6 = vmul.f32 %v367_v0, %v199_v63 }
  0xd9   :  { %v372_v12 = vmul.f32 %v368_v3, %v200_v2  ;;  %v318_v18 = vsel %vm317_vm10, %v481_v51, %v314_v60  ;;  %v354_v24 = vadd.f32 %v483_v11, %v353_v61 }
  0xda   :  { %v323_v20 = vsel %vm320_vm11, %v322_v55, %v318_v18 }
  0xdb   :  { %v375_v16 = vpack.c.bf16 %v372_v12, %v371_v6  ;;  %v324_v23 = vmul.f32 %v323_v20, %v299_v53  ;;  %v358_v28 = vsel %vm357_vm14, %v483_v11, %v354_v24 }
  0xdc   :  { %v363_v29 = vsel %vm360_vm15, %v362_v10, %v358_v28 }
  0xdd   :  { %377 = vst [vmem:[%s624_s3] sm:$0xff] %v375_v16  ;;  %v454_v26 = vclamps-f32 %v324_v23, 1.0  ;;  %v364_v31 = vmul.f32 %v363_v29, %v339_v27 }
  0xdf   :  { %v369_v30 = vadd.f32 1.0, %v454_v26  ;;  %v455_v33 = vclamps-f32 %v364_v31, 1.0 }
  0xe1   :  { %v373_v34 = vmul.f32 %v369_v30, %v201_v32  ;;  %v370_v56 = vadd.f32 1.0, %v455_v33 }
  0xe3   :  { %v374_v36 = vmul.f32 %v370_v56, %v202_v35 }
  0xe5   :  { %v376_v37 = vpack.c.bf16 %v374_v36, %v373_v34 }
  0xe7   :  { %378 = vst [vmem:[%s624_s3 + $0x8] sm:$0xff] %v376_v37 }
  0xe8   :  { %383 = vsyncpa [#allocation4], 1 }

// kernel: finbert_regressor.20
= control target key start
LH: loop header
LB: loop body
LE: loop exit
PB: predicated region body
PF: predicated region fallthrough
CT: control target
= control target key end

     0   :  { %11 = vsyncpa [#allocation4], 0  ;;  %s315_s24 = smov [#allocation3]   ;;  %s316_s26 = smov 64   ;;  %s375_s0 = inlined_call_operand.vmem [shape: bf16[16,128], index: 0, kind: input, shape index: {}]   ;;  %s376_s1 = inlined_call_operand.hbm [shape: bf16[128,128], index: 1, kind: input, shape index: {}]   ;;  %s377_s2 = inlined_call_operand.vmem [shape: f32[1,128], index: 2, kind: input, shape index: {}]   ;;  %s378_s3 = inlined_call_operand.vmem [shape: bf16[16,128], index: 3, kind: input, shape index: {}]   ;;  %s379_s4 = inlined_call_operand.vmem [shape: f32[1,128], index: 4, kind: input, shape index: {}]   ;;  %s380_s5 = inlined_call_operand.vmem [shape: f32[1,128], index: 5, kind: input, shape index: {}]   ;;  %s381_s6 = inlined_call_operand.vmem [shape: bf16[16,128], index: 6, kind: output, shape index: {}]  }
   0x1   :  { %s18_s23 = sshll.u32 %s376_s1, 4  ;;  %s20_s25 = sshll.u32 %s315_s24, 4  ;;  %s19_s23 = int_to_ptr.hbm [resolvable:$true] %s18_s23  ;;  %s21_s25 = int_to_ptr.vmem [resolvable:$true] %s20_s25 }
   0x2   :  { %s317_s27 = smov 4  }
   0x3   :  { %26 = dma.hbm_to_vmem [thread:$0]  %s19_s23, 1024, %s21_s25, [#allocation4], %s316_s26, %s316_s26, %s317_s27  }
   0x4   :  { %313 = dma.done.wait [#allocation4], 1024  }
   0x5   :  { %314 = vsyncadd [#allocation4], 4294966272  ;;  %v266_v0 = vld [vmem:[#allocation3 + $0x38] sm:$0xff]  ;;  %v265_v1 = vld [vmem:[#allocation3 + $0x30] sm:$0xff]  ;;  %v318_v19 = vmov 128.0  }
   0x6   :  { %119 = vmatpush.bf16.msra.mxu0 %v266_v0  ;;  %v264_v2 = vld [vmem:[#allocation3 + $0x28] sm:$0xff]  ;;  %v263_v3 = vld [vmem:[#allocation3 + $0x20] sm:$0xff]  ;;  %v262_v4 = vld [vmem:[#allocation3 + $0x18] sm:$0xff]  ;;  %283 = vrcp.f32 %v318_v19 }
   0x7   :  { %v261_v5 = vld [vmem:[#allocation3 + $0x10] sm:$0xff]  ;;  %v260_v6 = vld [vmem:[#allocation3 + $0x8] sm:$0xff]  ;;  %v259_v7 = vld [vmem:[#allocation3] sm:$0xff] }
   0x8   :  { %v258_v8 = vld [vmem:[%s375_s0] sm:$0xff] }
   0x9   :  { %v268_v9 = vld [vmem:[%s378_s3] sm:$0xff]  }
   0xa   :  { %120 = vmatpush.bf16.msra.mxu0 %v265_v1  ;;  %v280_v10 = vld [vmem:[%s377_s2] ss:$0 sm:$0xff]  ;;  %v269_v11 = vunpack.c.l.bf16 %v268_v9  ;;  %v270_v15 = vunpack.c.h.bf16 %v268_v9 }
   0xb   :  { %v281_v52 = vld [vmem:[%s379_s4] ss:$0 sm:$0xff] }
   0xc   :  { %v284_v20 = vpop.eup %283  ;;  %v282_v56 = vld [vmem:[%s380_s5] ss:$0 sm:$0xff] }
   0xd   :  { %v159_v21 = vmul.f32 128.0, %v284_v20  ;;  %vm163_vm0 = vweird.f32 %v284_v20 }
   0xe   :  { %121 = vmatpush.bf16.msra.mxu0 %v264_v2 }
   0xf   :  { %v160_v22 = vsub.f32 1.0, %v159_v21 }
  0x11   :  { %v161_v23 = vmul.f32 %v284_v20, %v160_v22 }
  0x12   :  { %122 = vmatpush.bf16.msra.mxu0 %v263_v3 }
  0x13   :  { %v162_v24 = vadd.f32 %v284_v20, %v161_v23 }
  0x15   :  { %v164_v25 = vsel %vm163_vm0, %v284_v20, %v162_v24 }
  0x16   :  { %123 = vmatpush.bf16.msra.mxu0 %v262_v4 }
  0x1a   :  { %124 = vmatpush.bf16.msra.mxu0 %v261_v5 }
  0x1e   :  { %125 = vmatpush.bf16.msra.mxu0 %v260_v6 }
  0x22   :  { %126 = vmatpush.bf16.msra.mxu0 %v259_v7 }
  0x25   :  { %127 = vmatmul.bf16.vlgmr.msra.gmra.mxu0 %v258_v8 }
  0xa2   :  { %v128_v12 = vpop.f32.mrf.mxu0 }
  0xa3   :  { %v146_v13 = vadd.f32 %v280_v10, %v128_v12 }
  0xa5   :  { %v152_v14 = vadd.f32 %v269_v11, %v146_v13 }
  0xa7   :  { %154 = vadd.xlane.f32.xlu0 %v152_v14 }
  0xaa   :  { %v130_v16 = vpop.f32.mrf.mxu0 }
  0xab   :  { %v147_v17 = vadd.f32 %v280_v10, %v130_v16 }
  0xad   :  { %v153_v18 = vadd.f32 %v270_v15, %v147_v17 }
  0xaf   :  { %156 = vadd.xlane.f32.xlu0 %v153_v18 }
 0x11a   :  { %v155_v26 = vpop.xlane.xlu0 %154 }
 0x11b   :  { %v165_v27 = vmul.f32 %v164_v25, %v155_v26 }
 0x11d   :  { %v167_v28 = vsub.f32 %v152_v14, %v165_v27 }
 0x11f   :  { %v169_v29 = vmul.f32 %v167_v28, %v167_v28 }
 0x121   :  { %171 = vadd.xlane.f32.xlu1 %v169_v29 }
 0x122   :  { %v157_v30 = vpop.xlane.xlu0 %156 }
 0x123   :  { %v166_v31 = vmul.f32 %v164_v25, %v157_v30 }
 0x125   :  { %v168_v32 = vsub.f32 %v153_v18, %v166_v31 }
 0x127   :  { %v170_v33 = vmul.f32 %v168_v32, %v168_v32 }
 0x129   :  { %173 = vadd.xlane.f32.xlu1 %v170_v33 }
 0x194   :  { %v172_v34 = vpop.xlane.xlu1 %171 }
 0x195   :  { %v175_v35 = vmul.f32 %v172_v34, %v164_v25 }
 0x197   :  { %v177_v36 = vadd.f32 1e-12, %v175_v35 }
 0x199   :  { %285 = vrsqrt.f32 %v177_v36  ;;  %vm185_vm2 = vweird.f32 %v177_v36 }
 0x19c   :  { %v174_v37 = vpop.xlane.xlu1 %173 }
 0x19d   :  { %v176_v38 = vmul.f32 %v174_v37, %v164_v25 }
 0x19f   :  { %v286_v39 = vpop.eup %285  ;;  %v178_v40 = vadd.f32 1e-12, %v176_v38 }
 0x1a0   :  { %v180_v41 = vmul.f32 %v286_v39, %v177_v36  ;;  %vm186_vm1 = vweird.f32 %v286_v39 }
 0x1a1   :  { %287 = vrsqrt.f32 %v178_v40  ;;  %vm187_vm3 = vmor %vm185_vm2, %vm186_vm1  ;;  %vm195_vm5 = vweird.f32 %v178_v40 }
 0x1a2   :  { %v181_v42 = vmul.f32 %v286_v39, %v180_v41 }
 0x1a4   :  { %v182_v43 = vmul.f32 0.5, %v181_v42 }
 0x1a6   :  { %v183_v44 = vsub.f32 1.5, %v182_v43 }
 0x1a7   :  { %v288_v45 = vpop.eup %287 }
 0x1a8   :  { %v184_v46 = vmul.f32 %v286_v39, %v183_v44  ;;  %v190_v47 = vmul.f32 %v288_v45, %v178_v40  ;;  %vm196_vm4 = vweird.f32 %v288_v45 }
 0x1a9   :  { %vm197_vm6 = vmor %vm195_vm5, %vm196_vm4 }
 0x1aa   :  { %v191_v48 = vmul.f32 %v288_v45, %v190_v47  ;;  %v188_v49 = vsel %vm187_vm3, %v286_v39, %v184_v46 }
 0x1ab   :  { %v199_v53 = vmul.f32 %v188_v49, %v167_v28 }
 0x1ac   :  { %v192_v50 = vmul.f32 0.5, %v191_v48 }
 0x1ad   :  { %v205_v57 = vmul.f32 %v281_v52, %v199_v53 }
 0x1ae   :  { %v193_v51 = vsub.f32 1.5, %v192_v50 }
 0x1af   :  { %v211_v60 = vadd.f32 %v282_v56, %v205_v57 }
 0x1b0   :  { %v194_v54 = vmul.f32 %v288_v45, %v193_v51 }
 0x1b2   :  { %v198_v55 = vsel %vm197_vm6, %v288_v45, %v194_v54 }
 0x1b3   :  { %v200_v58 = vmul.f32 %v198_v55, %v168_v32 }
 0x1b5   :  { %v206_v59 = vmul.f32 %v281_v52, %v200_v58 }
 0x1b7   :  { %v212_v61 = vadd.f32 %v282_v56, %v206_v59 }
 0x1b9   :  { %v274_v62 = vpack.c.bf16 %v212_v61, %v211_v60 }
 0x1bb   :  { %275 = vst [vmem:[%s381_s6] sm:$0xff] %v274_v62  }
 0x1bc   :  { %221 = vsyncpa [#allocation4], 1 }

// kernel: finbert_regressor.23
= control target key start
LH: loop header
LB: loop body
LE: loop exit
PB: predicated region body
PF: predicated region fallthrough
CT: control target
= control target key end

     0   :  { %s267_s0 = inlined_call_operand.vmem [shape: bf16[2,128], index: 0, kind: input, shape index: {}]   ;;  %s268_s1 = inlined_call_operand.hbm [shape: bf16[128,128], index: 1, kind: input, shape index: {}]   ;;  %s269_s2 = inlined_call_operand.vmem [shape: f32[1,128], index: 2, kind: input, shape index: {}]   ;;  %s270_s3 = inlined_call_operand.vmem [shape: f32[1,128], index: 3, kind: input, shape index: {}]   ;;  %s271_s4 = inlined_call_operand.<no memory space> [shape: f32[1,1], index: 4, kind: input, shape index: {}]   ;;  %s272_s5 = inlined_call_operand.vmem [shape: f32[2,1], index: 5, kind: output, shape index: {}]  }
   0x1   :  { %v10_v0 = vstv %s271_s4 }
   0x2   :  { %11 = vst [vmem:[#allocation2] sm:$0x1] %v10_v0 }
   0x3   :  { %12 = vsyncpa [#allocation4], 0  ;;  %s19_s22 = sshll.u32 %s268_s1, 4  ;;  %s216_s23 = smov [#allocation3]   ;;  %s20_s22 = int_to_ptr.hbm [resolvable:$true] %s19_s22 }
   0x4   :  { %s21_s24 = sshll.u32 %s216_s23, 4  ;;  %s217_s25 = smov 64   ;;  %s22_s24 = int_to_ptr.vmem [resolvable:$true] %s21_s24 }
   0x5   :  { %s218_s26 = smov 4  }
   0x6   :  { %27 = dma.hbm_to_vmem [thread:$0]  %s20_s22, 1024, %s22_s24, [#allocation4], %s217_s25, %s217_s25, %s218_s26  }
   0x7   :  { %214 = dma.done.wait [#allocation4], 1024  }
   0x8   :  { %215 = vsyncadd [#allocation4], 4294966272  ;;  %v181_v1 = vld [vmem:[#allocation3 + $0x38] sm:$0xff]  ;;  %v180_v2 = vld [vmem:[#allocation3 + $0x30] sm:$0xff]  ;;  %vm126_vm0 = vcmask 1041408   ;;  %vm135_vm1 = vcmask 1024  }
   0x9   :  { %107 = vmatpush.bf16.msra.mxu0 %v181_v1  ;;  %v179_v3 = vld [vmem:[#allocation3 + $0x28] sm:$0xff]  ;;  %v178_v4 = vld [vmem:[#allocation3 + $0x20] sm:$0xff]  ;;  %v177_v5 = vld [vmem:[#allocation3 + $0x18] sm:$0xff] }
   0xa   :  { %v176_v6 = vld [vmem:[#allocation3 + $0x10] sm:$0xff]  ;;  %v175_v7 = vld [vmem:[#allocation3 + $0x8] sm:$0xff]  ;;  %v174_v8 = vld [vmem:[#allocation3] sm:$0xff] }
   0xb   :  { %v38_v9 = vld [vmem:[%s267_s0] sm:$0x1] }
   0xc   :  { %v185_v10 = vld [vmem:[%s269_s2] ss:$0 sm:$0xff] }
   0xd   :  { %108 = vmatpush.bf16.msra.mxu0 %v180_v2  ;;  %v186_v13 = vld [vmem:[%s270_s3] ss:$0 sm:$0xff] }
   0xe   :  { %v187_v18 = vld [vmem:[#allocation2] ss:$0 sm:$0xff] }
  0x11   :  { %109 = vmatpush.bf16.msra.mxu0 %v179_v3 }
  0x15   :  { %110 = vmatpush.bf16.msra.mxu0 %v178_v4 }
  0x19   :  { %111 = vmatpush.bf16.msra.mxu0 %v177_v5 }
  0x1d   :  { %112 = vmatpush.bf16.msra.mxu0 %v176_v6 }
  0x21   :  { %113 = vmatpush.bf16.msra.mxu0 %v175_v7 }
  0x25   :  { %114 = vmatpush.bf16.msra.mxu0 %v174_v8 }
  0x28   :  { %115 = vmatmul.bf16.vlgmr.msra.gmra.mxu0 %v38_v9 }
  0xa5   :  { %v116_v11 = vpop.f32.mrf.mxu0 }
  0xa6   :  { %v117_v12 = vadd.f32 %v185_v10, %v116_v11 }
  0xa8   :  { %188 = vtanh.f32 %v117_v12 }
  0xad   :  { %v118_v14 = vpop.f32.mrf.mxu0 }
  0xae   :  { %v189_v15 = vpop.eup %188 }
  0xaf   :  { %v125_v16 = vmul.f32 %v189_v15, %v186_v13 }
  0xb1   :  { %v127_v17 = vsel %vm126_vm0, %v125_v16, 0.0 }
  0xb2   :  { %128 = vadd.xlane.f32.xlu0 %v127_v17 }
 0x125   :  { %v129_v19 = vpop.xlane.xlu0 %128 }
 0x126   :  { %v134_v20 = vadd.f32 %v187_v18, %v129_v19 }
 0x128   :  { %136 = vst.msk [vmem:[%s272_s5] sm:$0x3] %vm135_vm1, %v134_v20 }
 0x129   :  { %141 = vsyncpa [#allocation4], 1 }

// kernel: finbert_regressor.17
= control target key start
LH: loop header
LB: loop body
LE: loop exit
PB: predicated region body
PF: predicated region fallthrough
CT: control target
= control target key end

     0   :  { %11 = vsyncpa [#allocation4], 0  ;;  %s442_s24 = smov [#allocation3]   ;;  %s443_s26 = smov 64   ;;  %s511_s0 = inlined_call_operand.vmem [shape: bf16[16,256], index: 0, kind: input, shape index: {}]   ;;  %s512_s1 = inlined_call_operand.hbm [shape: bf16[256,128], index: 1, kind: input, shape index: {}]   ;;  %s513_s2 = inlined_call_operand.vmem [shape: f32[1,128], index: 2, kind: input, shape index: {}]   ;;  %s514_s3 = inlined_call_operand.vmem [shape: bf16[16,128], index: 3, kind: input, shape index: {}]   ;;  %s515_s4 = inlined_call_operand.vmem [shape: f32[1,128], index: 4, kind: input, shape index: {}]   ;;  %s516_s5 = inlined_call_operand.vmem [shape: f32[1,128], index: 5, kind: input, shape index: {}]   ;;  %s517_s6 = inlined_call_operand.vmem [shape: bf16[16,128], index: 6, kind: output, shape index: {}]  }
   0x1   :  { %s18_s23 = sshll.u32 %s512_s1, 4  ;;  %s20_s25 = sshll.u32 %s442_s24, 4  ;;  %s19_s23 = int_to_ptr.hbm [resolvable:$true] %s18_s23  ;;  %s21_s25 = int_to_ptr.vmem [resolvable:$true] %s20_s25 }
   0x2   :  { %s444_s27 = smov 4  }
   0x3   :  { %26 = dma.hbm_to_vmem [thread:$0]  %s19_s23, 2048, %s21_s25, [#allocation4], %s443_s26, %s443_s26, %s444_s27  }
   0x4   :  { %440 = dma.done.wait [#allocation4], 2048  }
   0x5   :  { %441 = vsyncadd [#allocation4], 4294965248  ;;  %v385_v0 = vld [vmem:[#allocation3 + $0x38] sm:$0xff]  ;;  %v384_v2 = vld [vmem:[#allocation3 + $0x30] sm:$0xff]  ;;  %v445_v36 = vmov 128.0  }
   0x6   :  { %v393_v1 = vld [vmem:[#allocation3 + $0x78] sm:$0xff]  ;;  %187 = vmatpush.bf16.msra.mxu0 %v385_v0  ;;  %v392_v3 = vld [vmem:[#allocation3 + $0x70] sm:$0xff]  ;;  %v383_v4 = vld [vmem:[#allocation3 + $0x28] sm:$0xff]  ;;  %410 = vrcp.f32 %v445_v36 }
   0x7   :  { %201 = vmatpush.bf16.msra.mxu1 %v393_v1  ;;  %v391_v5 = vld [vmem:[#allocation3 + $0x68] sm:$0xff]  ;;  %v382_v6 = vld [vmem:[#allocation3 + $0x20] sm:$0xff]  ;;  %v381_v8 = vld [vmem:[#allocation3 + $0x18] sm:$0xff] }
   0x8   :  { %v390_v7 = vld [vmem:[#allocation3 + $0x60] sm:$0xff]  ;;  %v389_v9 = vld [vmem:[#allocation3 + $0x58] sm:$0xff]  ;;  %v380_v10 = vld [vmem:[#allocation3 + $0x10] sm:$0xff] }
   0x9   :  { %v388_v11 = vld [vmem:[#allocation3 + $0x50] sm:$0xff]  ;;  %v379_v12 = vld [vmem:[#allocation3 + $0x8] sm:$0xff]  ;;  %v378_v14 = vld [vmem:[#allocation3] sm:$0xff] }
   0xa   :  { %188 = vmatpush.bf16.msra.mxu0 %v384_v2  ;;  %v387_v13 = vld [vmem:[#allocation3 + $0x48] sm:$0xff]  ;;  %v386_v15 = vld [vmem:[#allocation3 + $0x40] sm:$0xff] }
   0xb   :  { %202 = vmatpush.bf16.msra.mxu1 %v392_v3  ;;  %v306_v16 = vld [vmem:[%s511_s0] sm:$0xf]  ;;  %v377_v17 = vld [vmem:[%s511_s0 + $0x4] sm:$0xf0]  ;;  %v376_v18 = vld [vmem:[%s511_s0 + $0x4] sm:$0xf] }
   0xc   :  { %v308_v19 = vld [vmem:[%s511_s0 + $0x8] sm:$0xf0]  ;;  %v307_v20 = vor.u32 %v377_v17, %v306_v16  ;;  %v395_v22 = vld [vmem:[%s514_s3] sm:$0xff]   ;;  %v411_v37 = vpop.eup %410 }
   0xd   :  { %v311_v21 = vor.u32 %v376_v18, %v308_v19  ;;  %v407_v23 = vld [vmem:[%s513_s2] ss:$0 sm:$0xff]  ;;  %v396_v27 = vunpack.c.l.bf16 %v395_v22  ;;  %v397_v33 = vunpack.c.h.bf16 %v395_v22  ;;  %v241_v38 = vmul.f32 128.0, %v411_v37 }
   0xe   :  { %189 = vmatpush.bf16.msra.mxu0 %v383_v4  ;;  %vm245_vm0 = vweird.f32 %v411_v37 }
   0xf   :  { %203 = vmatpush.bf16.msra.mxu1 %v391_v5  ;;  %v242_v39 = vsub.f32 1.0, %v241_v38  ;;  %v408_v5 = vld [vmem:[%s515_s4] ss:$0 sm:$0xff] }
  0x11   :  { %v243_v40 = vmul.f32 %v411_v37, %v242_v39 }
  0x12   :  { %190 = vmatpush.bf16.msra.mxu0 %v382_v6 }
  0x13   :  { %204 = vmatpush.bf16.msra.mxu1 %v390_v7  ;;  %v244_v41 = vadd.f32 %v411_v37, %v243_v40 }
  0x15   :  { %v246_v42 = vsel %vm245_vm0, %v411_v37, %v244_v41 }
  0x16   :  { %191 = vmatpush.bf16.msra.mxu0 %v381_v8 }
  0x17   :  { %205 = vmatpush.bf16.msra.mxu1 %v389_v9  ;;  %v409_v9 = vld [vmem:[%s516_s5] ss:$0 sm:$0xff] }
  0x1a   :  { %192 = vmatpush.bf16.msra.mxu0 %v380_v10 }
  0x1b   :  { %206 = vmatpush.bf16.msra.mxu1 %v388_v11 }
  0x1e   :  { %193 = vmatpush.bf16.msra.mxu0 %v379_v12 }
  0x1f   :  { %207 = vmatpush.bf16.msra.mxu1 %v387_v13 }
  0x22   :  { %194 = vmatpush.bf16.msra.mxu0 %v378_v14 }
  0x23   :  { %208 = vmatpush.bf16.msra.mxu1 %v386_v15 }
  0x25   :  { %195 = vmatmul.bf16.vlgmr.msra.gmra.mxu0 %v307_v20 }
  0x26   :  { %209 = vmatmul.bf16.vlgmr.msra.gmra.mxu1 %v311_v21 }
  0xa2   :  { %v196_v24 = vpop.f32.mrf.mxu0 }
  0xa3   :  { %v210_v25 = vpop.f32.mrf.mxu1 }
  0xa4   :  { %v211_v26 = vadd.f32 %v210_v25, %v196_v24 }
  0xa6   :  { %v228_v28 = vadd.f32 %v407_v23, %v211_v26 }
  0xa8   :  { %v234_v29 = vadd.f32 %v396_v27, %v228_v28 }
  0xaa   :  { %236 = vadd.xlane.f32.xlu0 %v234_v29  ;;  %v198_v30 = vpop.f32.mrf.mxu0 }
  0xab   :  { %v212_v31 = vpop.f32.mrf.mxu1 }
  0xac   :  { %v213_v32 = vadd.f32 %v212_v31, %v198_v30 }
  0xae   :  { %v229_v34 = vadd.f32 %v407_v23, %v213_v32 }
  0xb0   :  { %v235_v35 = vadd.f32 %v397_v33, %v229_v34 }
  0xb2   :  { %238 = vadd.xlane.f32.xlu0 %v235_v35 }
 0x11d   :  { %v237_v43 = vpop.xlane.xlu0 %236 }
 0x11e   :  { %v247_v44 = vmul.f32 %v246_v42, %v237_v43 }
 0x120   :  { %v249_v45 = vsub.f32 %v234_v29, %v247_v44 }
 0x122   :  { %v251_v46 = vmul.f32 %v249_v45, %v249_v45 }
 0x124   :  { %253 = vadd.xlane.f32.xlu1 %v251_v46 }
 0x125   :  { %v239_v47 = vpop.xlane.xlu0 %238 }
 0x126   :  { %v248_v48 = vmul.f32 %v246_v42, %v239_v47 }
 0x128   :  { %v250_v49 = vsub.f32 %v235_v35, %v248_v48 }
 0x12a   :  { %v252_v50 = vmul.f32 %v250_v49, %v250_v49 }
 0x12c   :  { %255 = vadd.xlane.f32.xlu1 %v252_v50 }
 0x197   :  { %v254_v51 = vpop.xlane.xlu1 %253 }
 0x198   :  { %v257_v52 = vmul.f32 %v254_v51, %v246_v42 }
 0x19a   :  { %v259_v53 = vadd.f32 1e-12, %v257_v52 }
 0x19c   :  { %412 = vrsqrt.f32 %v259_v53  ;;  %vm267_vm2 = vweird.f32 %v259_v53 }
 0x19f   :  { %v256_v54 = vpop.xlane.xlu1 %255 }
 0x1a0   :  { %v258_v55 = vmul.f32 %v256_v54, %v246_v42 }
 0x1a2   :  { %v413_v56 = vpop.eup %412  ;;  %v260_v57 = vadd.f32 1e-12, %v258_v55 }
 0x1a3   :  { %v262_v58 = vmul.f32 %v413_v56, %v259_v53  ;;  %vm268_vm1 = vweird.f32 %v413_v56 }
 0x1a4   :  { %414 = vrsqrt.f32 %v260_v57  ;;  %vm269_vm3 = vmor %vm267_vm2, %vm268_vm1  ;;  %vm277_vm5 = vweird.f32 %v260_v57 }
 0x1a5   :  { %v263_v59 = vmul.f32 %v413_v56, %v262_v58 }
 0x1a7   :  { %v264_v60 = vmul.f32 0.5, %v263_v59 }
 0x1a9   :  { %v265_v61 = vsub.f32 1.5, %v264_v60 }
 0x1aa   :  { %v415_v62 = vpop.eup %414 }
 0x1ab   :  { %v266_v63 = vmul.f32 %v413_v56, %v265_v61  ;;  %v272_v0 = vmul.f32 %v415_v62, %v260_v57  ;;  %vm278_vm4 = vweird.f32 %v415_v62 }
 0x1ac   :  { %vm279_vm6 = vmor %vm277_vm5, %vm278_vm4 }
 0x1ad   :  { %v273_v1 = vmul.f32 %v415_v62, %v272_v0  ;;  %v270_v2 = vsel %vm269_vm3, %v413_v56, %v266_v63 }
 0x1ae   :  { %v281_v6 = vmul.f32 %v270_v2, %v249_v45 }
 0x1af   :  { %v274_v3 = vmul.f32 0.5, %v273_v1 }
 0x1b0   :  { %v287_v10 = vmul.f32 %v408_v5, %v281_v6 }
 0x1b1   :  { %v275_v4 = vsub.f32 1.5, %v274_v3 }
 0x1b2   :  { %v293_v13 = vadd.f32 %v409_v9, %v287_v10 }
 0x1b3   :  { %v276_v7 = vmul.f32 %v415_v62, %v275_v4 }
 0x1b5   :  { %v280_v8 = vsel %vm279_vm6, %v415_v62, %v276_v7 }
 0x1b6   :  { %v282_v11 = vmul.f32 %v280_v8, %v250_v49 }
 0x1b8   :  { %v288_v12 = vmul.f32 %v408_v5, %v282_v11 }
 0x1ba   :  { %v294_v14 = vadd.f32 %v409_v9, %v288_v12 }
 0x1bc   :  { %v401_v15 = vpack.c.bf16 %v294_v14, %v293_v13 }
 0x1be   :  { %402 = vst [vmem:[%s517_s6] sm:$0xff] %v401_v15  }
 0x1bf   :  { %303 = vsyncpa [#allocation4], 1 }

</bundles_post_ra>
